<compile_context>
chip_gen: v5e
topology: v5e:2x2
jax: 0.10.0
libtpu: 0.0.40
codegen_flags: <defaults>
</compile_context>

<pallas_src>
import jax
import jax.numpy as jnp
from jax.experimental import pallas as pl
from jax.experimental.pallas import tpu as pltpu

_EPS = 1e-5
_ALPHA = 0.2
_LANE = 128


def _round_up(n, m):
    return ((n + m - 1) // m) * m


def _make_kernel(h1p, outp):
    """Build the kernel closure with static lane offsets into the packed vector.

    Packed (1, h1p + 2*128 + 2*256 + outp) f32 layout: [b1 | g2 | be2 | g3 | be3 | b4],
    every segment 128-lane aligned."""
    o_b1 = 0
    o_g2 = o_b1 + h1p
    o_be2 = o_g2 + 128
    o_g3 = o_be2 + 128
    o_be3 = o_g3 + 256
    o_b4 = o_be3 + 256

    def kernel(x_ref, w1_ref, w2_ref, w3_ref, w4_ref, vec_ref, o_ref):
        inv_b = 1.0 / x_ref.shape[0]

        b1 = vec_ref[:, o_b1:o_b1 + h1p]
        g2 = vec_ref[:, o_g2:o_g2 + 128]
        be2 = vec_ref[:, o_be2:o_be2 + 128]
        g3 = vec_ref[:, o_g3:o_g3 + 256]
        be3 = vec_ref[:, o_be3:o_be3 + 256]
        b4 = vec_ref[:, o_b4:o_b4 + outp]

        def leaky(h):
            # mul + max (2 VPU ops) instead of cmp + mul + select.
            return jnp.maximum(h, _ALPHA * h)

        def batchnorm(h, g, be):
            # Single-pass biased variance + folded affine: h*s + t.
            mu = jnp.sum(h, axis=0, keepdims=True) * inv_b
            msq = jnp.sum(h * h, axis=0, keepdims=True) * inv_b
            var = jnp.maximum(msq - mu * mu, 0.0)
            s = g * jax.lax.rsqrt(var + _EPS)
            t = be - mu * s
            return h * s + t

        x = x_ref[...]                       # already bf16, lane-dense (B, 128)

        # Layer 1: Linear(latent -> 64, padded to 128 lanes) + LeakyReLU
        h = jnp.dot(x, w1_ref[...], preferred_element_type=jnp.float32) + b1
        h = leaky(h)

        # Layer 2: Linear(128 -> 128) + BatchNorm (bias dropped: cancelled by BN)
        h = jnp.dot(h.astype(jnp.bfloat16), w2_ref[...],
                    preferred_element_type=jnp.float32)
        h = leaky(batchnorm(h, g2, be2))

        # Layer 3: Linear(128 -> 256) + BatchNorm (bias dropped: cancelled by BN)
        h = jnp.dot(h.astype(jnp.bfloat16), w3_ref[...],
                    preferred_element_type=jnp.float32)
        h = leaky(batchnorm(h, g3, be3))

        # Layer 4: Linear(256 -> out, padded to 128-multiple lanes) + Sigmoid
        h = jnp.dot(h.astype(jnp.bfloat16), w4_ref[...],
                    preferred_element_type=jnp.float32) + b4
        o_ref[...] = (0.5 * (jnp.tanh(0.5 * h) + 1.0)).astype(o_ref.dtype)

    return kernel


def init_generator_params(key, latent_dim, output_dim):
    """PyTorch-style init: U(-1/sqrt(fan_in), 1/sqrt(fan_in)) for Linear weight/bias;
    BatchNorm gamma=1, beta=0. Weights stored transposed, i.e. (in, out)."""
    dims = [(latent_dim, 64), (64, 128), (128, 256), (256, output_dim)]
    params = {}
    keys = jax.random.split(key, 2 * len(dims))
    for i, (fin, fout) in enumerate(dims):
        bound = 1.0 / (fin ** 0.5)
        params[f"w{i + 1}"] = jax.random.uniform(
            keys[2 * i], (fin, fout), jnp.float32, -bound, bound)
        params[f"b{i + 1}"] = jax.random.uniform(
            keys[2 * i + 1], (1, fout), jnp.float32, -bound, bound)
    params["g2"] = jnp.ones((1, 128), jnp.float32)
    params["be2"] = jnp.zeros((1, 128), jnp.float32)
    params["g3"] = jnp.ones((1, 256), jnp.float32)
    params["be3"] = jnp.zeros((1, 256), jnp.float32)
    return params


def pack_generator_params(params):
    """Zero-pad lane dims to multiples of 128, cast matmul weights to bf16,
    drop b2/b3 (cancelled by the following BatchNorm) and pack all remaining
    (1,N) vectors into one lane-aligned f32 array."""
    latent_dim = params["w1"].shape[0]
    output_dim = params["w4"].shape[1]
    latp = _round_up(latent_dim, _LANE)
    h1p = _round_up(64, _LANE)
    outp = _round_up(output_dim, _LANE)

    def pad2(a, rows, cols):
        z = jnp.zeros((rows, cols), jnp.float32)
        return z.at[:a.shape[0], :a.shape[1]].set(a)

    vec = jnp.concatenate([
        pad2(params["b1"], 1, h1p),
        params["g2"], params["be2"],
        params["g3"], params["be3"],
        pad2(params["b4"], 1, outp),
    ], axis=1)

    packed = {
        "w1": pad2(params["w1"], latp, h1p).astype(jnp.bfloat16),
        "w2": pad2(params["w2"], h1p, 128).astype(jnp.bfloat16),
        "w3": params["w3"].astype(jnp.bfloat16),
        "w4": pad2(params["w4"], 256, outp).astype(jnp.bfloat16),
        "vec": vec,
    }
    return packed, output_dim


def generator_forward(x, packed, output_dim):
    """x: (B, latent_dim) float32. Returns (B, output_dim) float32."""
    B, latent_dim = x.shape
    latp = packed["w1"].shape[0]
    h1p = packed["w1"].shape[1]
    outp = packed["w4"].shape[1]

    # Lane-dense bf16 input: zero-padded latent columns (matching zero rows of w1).
    xp = jnp.zeros((B, latp), jnp.bfloat16)
    xp = xp.at[:, :latent_dim].set(x.astype(jnp.bfloat16))

    args = (xp, packed["w1"], packed["w2"], packed["w3"], packed["w4"], packed["vec"])
    vmem = pl.BlockSpec(memory_space=pltpu.MemorySpace.VMEM)

    flops = 2 * B * (latp * h1p + h1p * 128 + 128 * 256 + 256 * outp)
    transcendentals = B * outp + 2 * (128 + 256)   # tanh + rsqrt
    bytes_accessed = (sum(int(a.size) * a.dtype.itemsize for a in args)
                      + B * outp * 2)

    # Honest VMEM estimate: ~4 KiB of live activations per row + double-buffered
    # small inputs/output + headroom.  Fits v7x's 64 MiB scoped budget easily.
    vmem_limit = min(64 * 1024 * 1024, 2 * 1024 * 1024 + 8 * 1024 * B)

    out = pl.pallas_call(
        _make_kernel(h1p, outp),
        out_shape=jax.ShapeDtypeStruct((B, outp), jnp.bfloat16),
        in_specs=[vmem] * len(args),
        out_specs=vmem,
        compiler_params=pltpu.CompilerParams(vmem_limit_bytes=vmem_limit),
        cost_estimate=pl.CostEstimate(flops=flops,
                                      transcendentals=transcendentals,
                                      bytes_accessed=bytes_accessed),
    )(*args)
    return out[:, :output_dim].astype(jnp.float32)


def _reference_forward(x, params):
    """Pure-JAX f32 reference of the PyTorch training-mode forward (keeps b2/b3)."""
    def leaky(h):
        return jnp.where(h > 0, h, _ALPHA * h)

    def bn(h, g, be):
        mu = jnp.mean(h, axis=0, keepdims=True)
        var = jnp.mean((h - mu) ** 2, axis=0, keepdims=True)
        return (h - mu) * jax.lax.rsqrt(var + _EPS) * g + be

    h = leaky(x @ params["w1"] + params["b1"])
    h = leaky(bn(h @ params["w2"] + params["b2"], params["g2"], params["be2"]))
    h = leaky(bn(h @ params["w3"] + params["b3"], params["g3"], params["be3"]))
    h = h @ params["w4"] + params["b4"]
    return 1.0 / (1.0 + jnp.exp(-h))


if __name__ == "__main__":
    latent_dim = 16
    output_dim = 32
    batch = 256   # >= 256 rows so the 256-wide MXU (v6e/v7x) is fully streamed

    key = jax.random.PRNGKey(0)
    k_x, k_p = jax.random.split(key)
    x = jax.random.normal(k_x, (batch, latent_dim), dtype=jnp.float32)

    params = init_generator_params(k_p, latent_dim, output_dim)
    packed, out_dim = pack_generator_params(params)

    out = generator_forward(x, packed, out_dim)
    out = jax.block_until_ready(out)

    ref = _reference_forward(x, params)

    assert out.shape == (batch, output_dim)
    assert bool(jnp.all(jnp.isfinite(out)))
    assert bool(jnp.all((out >= 0.0) & (out <= 1.0)))          # sigmoid range
    assert float(jnp.max(jnp.abs(out - ref))) < 5e-2           # bf16-matmul tolerance
    print("KERNEL_OK")
</pallas_src>

<mosaic_0001>
module attributes {stable_mosaic.version = 11 : i64} {
  func.func @kernel(%arg0: memref<256x128xbf16, #tpu.memory_space<vmem>>, %arg1: memref<128x128xbf16, #tpu.memory_space<vmem>>, %arg2: memref<128x128xbf16, #tpu.memory_space<vmem>>, %arg3: memref<128x256xbf16, #tpu.memory_space<vmem>>, %arg4: memref<256x128xbf16, #tpu.memory_space<vmem>>, %arg5: memref<1x1024xf32, #tpu.memory_space<vmem>>, %arg6: memref<256x128xbf16, #tpu.memory_space<vmem>>) attributes {dimension_semantics = [], scalar_prefetch = 0 : i64, scratch_operands = 0 : i64, tpu.core_type = #tpu.core_type<tc>} {
    %c0 = arith.constant 0 : index
    %c0_0 = arith.constant 0 : index
    %0 = vector.load %arg5[%c0, %c0_0] : memref<1x1024xf32, #tpu.memory_space<vmem>>, vector<1x128xf32>
    %c0_1 = arith.constant 0 : index
    %c128 = arith.constant 128 : index
    %1 = vector.load %arg5[%c0_1, %c128] : memref<1x1024xf32, #tpu.memory_space<vmem>>, vector<1x128xf32>
    %c0_2 = arith.constant 0 : index
    %c256 = arith.constant 256 : index
    %2 = vector.load %arg5[%c0_2, %c256] : memref<1x1024xf32, #tpu.memory_space<vmem>>, vector<1x128xf32>
    %c0_3 = arith.constant 0 : index
    %c384 = arith.constant 384 : index
    %3 = vector.load %arg5[%c0_3, %c384] : memref<1x1024xf32, #tpu.memory_space<vmem>>, vector<1x256xf32>
    %c0_4 = arith.constant 0 : index
    %c640 = arith.constant 640 : index
    %4 = vector.load %arg5[%c0_4, %c640] : memref<1x1024xf32, #tpu.memory_space<vmem>>, vector<1x256xf32>
    %c0_5 = arith.constant 0 : index
    %c896 = arith.constant 896 : index
    %5 = vector.load %arg5[%c0_5, %c896] : memref<1x1024xf32, #tpu.memory_space<vmem>>, vector<1x128xf32>
    %c0_6 = arith.constant 0 : index
    %c0_7 = arith.constant 0 : index
    %6 = vector.load %arg0[%c0_6, %c0_7] : memref<256x128xbf16, #tpu.memory_space<vmem>>, vector<256x128xbf16>
    %c0_8 = arith.constant 0 : index
    %c0_9 = arith.constant 0 : index
    %7 = vector.load %arg1[%c0_8, %c0_9] : memref<128x128xbf16, #tpu.memory_space<vmem>>, vector<128x128xbf16>
    %cst = arith.constant dense<0.000000e+00> : vector<256x128xf32>
    %8 = tpu.matmul %6, %7, %cst {dimension_numbers = #tpu.dot_dimension_numbers<[1], [0], [0], [1], [0, 0, 1, 1], [], []>} : vector<256x128xbf16>, vector<128x128xbf16>, vector<256x128xf32> -> vector<256x128xf32>
    %9 = vector.broadcast %0 : vector<1x128xf32> to vector<256x128xf32>
    %10 = arith.addf %8, %9 : vector<256x128xf32>
    %cst_10 = arith.constant 2.000000e-01 : f32
    %11 = vector.broadcast %cst_10 : f32 to vector<256x128xf32>
    %12 = arith.mulf %11, %10 : vector<256x128xf32>
    %13 = arith.maximumf %10, %12 : vector<256x128xf32>
    %14 = arith.truncf %13 : vector<256x128xf32> to vector<256x128xbf16>
    %c0_11 = arith.constant 0 : index
    %c0_12 = arith.constant 0 : index
    %15 = vector.load %arg2[%c0_11, %c0_12] : memref<128x128xbf16, #tpu.memory_space<vmem>>, vector<128x128xbf16>
    %cst_13 = arith.constant dense<0.000000e+00> : vector<256x128xf32>
    %16 = tpu.matmul %14, %15, %cst_13 {dimension_numbers = #tpu.dot_dimension_numbers<[1], [0], [0], [1], [0, 0, 1, 1], [], []>} : vector<256x128xbf16>, vector<128x128xbf16>, vector<256x128xf32> -> vector<256x128xf32>
    %cst_14 = arith.constant dense<0.000000e+00> : vector<128xf32>
    %17 = vector.multi_reduction <add>, %16, %cst_14 [0] : vector<256x128xf32> to vector<128xf32>
    %18 = vector.shape_cast %17 : vector<128xf32> to vector<1x128xf32>
    %cst_15 = arith.constant 3.906250e-03 : f32
    %19 = vector.broadcast %cst_15 : f32 to vector<1x128xf32>
    %20 = arith.mulf %18, %19 : vector<1x128xf32>
    %21 = arith.mulf %16, %16 : vector<256x128xf32>
    %cst_16 = arith.constant dense<0.000000e+00> : vector<128xf32>
    %22 = vector.multi_reduction <add>, %21, %cst_16 [0] : vector<256x128xf32> to vector<128xf32>
    %23 = vector.shape_cast %22 : vector<128xf32> to vector<1x128xf32>
    %cst_17 = arith.constant 3.906250e-03 : f32
    %24 = vector.broadcast %cst_17 : f32 to vector<1x128xf32>
    %25 = arith.mulf %23, %24 : vector<1x128xf32>
    %26 = arith.mulf %20, %20 : vector<1x128xf32>
    %27 = arith.subf %25, %26 : vector<1x128xf32>
    %cst_18 = arith.constant 0.000000e+00 : f32
    %28 = vector.broadcast %cst_18 : f32 to vector<1x128xf32>
    %29 = arith.maximumf %27, %28 : vector<1x128xf32>
    %cst_19 = arith.constant 9.99999974E-6 : f32
    %30 = vector.broadcast %cst_19 : f32 to vector<1x128xf32>
    %31 = arith.addf %29, %30 : vector<1x128xf32>
    %32 = math.rsqrt %31 : vector<1x128xf32>
    %33 = arith.mulf %1, %32 : vector<1x128xf32>
    %34 = arith.mulf %20, %33 : vector<1x128xf32>
    %35 = arith.subf %2, %34 : vector<1x128xf32>
    %36 = vector.broadcast %33 : vector<1x128xf32> to vector<256x128xf32>
    %37 = arith.mulf %16, %36 : vector<256x128xf32>
    %38 = vector.broadcast %35 : vector<1x128xf32> to vector<256x128xf32>
    %39 = arith.addf %37, %38 : vector<256x128xf32>
    %cst_20 = arith.constant 2.000000e-01 : f32
    %40 = vector.broadcast %cst_20 : f32 to vector<256x128xf32>
    %41 = arith.mulf %40, %39 : vector<256x128xf32>
    %42 = arith.maximumf %39, %41 : vector<256x128xf32>
    %43 = arith.truncf %42 : vector<256x128xf32> to vector<256x128xbf16>
    %c0_21 = arith.constant 0 : index
    %c0_22 = arith.constant 0 : index
    %44 = vector.load %arg3[%c0_21, %c0_22] : memref<128x256xbf16, #tpu.memory_space<vmem>>, vector<128x256xbf16>
    %cst_23 = arith.constant dense<0.000000e+00> : vector<256x256xf32>
    %45 = tpu.matmul %43, %44, %cst_23 {dimension_numbers = #tpu.dot_dimension_numbers<[1], [0], [0], [1], [0, 0, 1, 1], [], []>} : vector<256x128xbf16>, vector<128x256xbf16>, vector<256x256xf32> -> vector<256x256xf32>
    %cst_24 = arith.constant dense<0.000000e+00> : vector<256xf32>
    %46 = vector.multi_reduction <add>, %45, %cst_24 [0] : vector<256x256xf32> to vector<256xf32>
    %47 = vector.shape_cast %46 : vector<256xf32> to vector<1x256xf32>
    %cst_25 = arith.constant 3.906250e-03 : f32
    %48 = vector.broadcast %cst_25 : f32 to vector<1x256xf32>
    %49 = arith.mulf %47, %48 : vector<1x256xf32>
    %50 = arith.mulf %45, %45 : vector<256x256xf32>
    %cst_26 = arith.constant dense<0.000000e+00> : vector<256xf32>
    %51 = vector.multi_reduction <add>, %50, %cst_26 [0] : vector<256x256xf32> to vector<256xf32>
    %52 = vector.shape_cast %51 : vector<256xf32> to vector<1x256xf32>
    %cst_27 = arith.constant 3.906250e-03 : f32
    %53 = vector.broadcast %cst_27 : f32 to vector<1x256xf32>
    %54 = arith.mulf %52, %53 : vector<1x256xf32>
    %55 = arith.mulf %49, %49 : vector<1x256xf32>
    %56 = arith.subf %54, %55 : vector<1x256xf32>
    %cst_28 = arith.constant 0.000000e+00 : f32
    %57 = vector.broadcast %cst_28 : f32 to vector<1x256xf32>
    %58 = arith.maximumf %56, %57 : vector<1x256xf32>
    %cst_29 = arith.constant 9.99999974E-6 : f32
    %59 = vector.broadcast %cst_29 : f32 to vector<1x256xf32>
    %60 = arith.addf %58, %59 : vector<1x256xf32>
    %61 = math.rsqrt %60 : vector<1x256xf32>
    %62 = arith.mulf %3, %61 : vector<1x256xf32>
    %63 = arith.mulf %49, %62 : vector<1x256xf32>
    %64 = arith.subf %4, %63 : vector<1x256xf32>
    %65 = vector.broadcast %62 : vector<1x256xf32> to vector<256x256xf32>
    %66 = arith.mulf %45, %65 : vector<256x256xf32>
    %67 = vector.broadcast %64 : vector<1x256xf32> to vector<256x256xf32>
    %68 = arith.addf %66, %67 : vector<256x256xf32>
    %cst_30 = arith.constant 2.000000e-01 : f32
    %69 = vector.broadcast %cst_30 : f32 to vector<256x256xf32>
    %70 = arith.mulf %69, %68 : vector<256x256xf32>
    %71 = arith.maximumf %68, %70 : vector<256x256xf32>
    %72 = arith.truncf %71 : vector<256x256xf32> to vector<256x256xbf16>
    %c0_31 = arith.constant 0 : index
    %c0_32 = arith.constant 0 : index
    %73 = vector.load %arg4[%c0_31, %c0_32] : memref<256x128xbf16, #tpu.memory_space<vmem>>, vector<256x128xbf16>
    %cst_33 = arith.constant dense<0.000000e+00> : vector<256x128xf32>
    %74 = tpu.matmul %72, %73, %cst_33 {dimension_numbers = #tpu.dot_dimension_numbers<[1], [0], [0], [1], [0, 0, 1, 1], [], []>} : vector<256x256xbf16>, vector<256x128xbf16>, vector<256x128xf32> -> vector<256x128xf32>
    %75 = vector.broadcast %5 : vector<1x128xf32> to vector<256x128xf32>
    %76 = arith.addf %74, %75 : vector<256x128xf32>
    %cst_34 = arith.constant 5.000000e-01 : f32
    %77 = vector.broadcast %cst_34 : f32 to vector<256x128xf32>
    %78 = arith.mulf %77, %76 : vector<256x128xf32>
    %79 = math.tanh %78 : vector<256x128xf32>
    %cst_35 = arith.constant 1.000000e+00 : f32
    %80 = vector.broadcast %cst_35 : f32 to vector<256x128xf32>
    %81 = arith.addf %79, %80 : vector<256x128xf32>
    %cst_36 = arith.constant 5.000000e-01 : f32
    %82 = vector.broadcast %cst_36 : f32 to vector<256x128xf32>
    %83 = arith.mulf %82, %81 : vector<256x128xf32>
    %84 = arith.truncf %83 : vector<256x128xf32> to vector<256x128xbf16>
    %c0_37 = arith.constant 0 : index
    %c0_38 = arith.constant 0 : index
    %85 = vector.load %arg6[%c0_37, %c0_38] : memref<256x128xbf16, #tpu.memory_space<vmem>>, vector<256x128xbf16>
    tpu.vector_store %arg6[%c0_37, %c0_38], %84 {strides = array<i32>} : memref<256x128xbf16, #tpu.memory_space<vmem>>, vector<256x128xbf16>,
    return
  }
}

</mosaic_0001>

<bundles_post_ra>
// kernel: tpu_custom_call.1
= control target key start
LH: loop header
LB: loop body
LE: loop exit
PB: predicated region body
PF: predicated region fallthrough
CT: control target
= control target key end

     0   :  { %11 = vsyncpa [#allocation3], 0  ;;  %s4455_s0 = inlined_call_operand.hbm [shape: bf16[256,128], index: 0, kind: input, shape index: {}]   ;;  %s4456_s1 = inlined_call_operand.hbm [shape: bf16[128,128], index: 1, kind: input, shape index: {}]   ;;  %s4457_s2 = inlined_call_operand.hbm [shape: bf16[128,128], index: 2, kind: input, shape index: {}]   ;;  %s4458_s3 = inlined_call_operand.hbm [shape: bf16[128,256], index: 3, kind: input, shape index: {}]   ;;  %s4459_s4 = inlined_call_operand.hbm [shape: bf16[256,128], index: 4, kind: input, shape index: {}]   ;;  %s4460_s5 = inlined_call_operand.hbm [shape: f32[1,1024], index: 5, kind: input, shape index: {}]   ;;  %s4461_s6 = inlined_call_operand.hbm [shape: bf16[256,128], index: 6, kind: output, shape index: {}]  }
   0x1   :  { %12 = vsyncpa [#allocation6], 0 }
   0x2   :  { %13 = vsyncpa [#allocation9], 0 }
   0x3   :  { %14 = vsyncpa [#allocation12], 0 }
   0x4   :  { %15 = vsyncpa [#allocation4], 0  ;;  %s33_s23 = sshll.u32 %s4456_s1, 4  ;;  %s2960_s24 = smov [#allocation5]   ;;  %s34_s23 = int_to_ptr.hbm [resolvable:$true] %s33_s23 }
   0x5   :  { %s35_s25 = sshll.u32 %s2960_s24, 4  ;;  %s59_s28 = sshll.u32 %s4458_s3, 4  ;;  %s36_s25 = int_to_ptr.vmem [resolvable:$true] %s35_s25  ;;  %s60_s28 = int_to_ptr.hbm [resolvable:$true] %s59_s28 }
   0x6   :  { %s2961_s29 = smov 64   ;;  %s2962_s30 = smov 4  }
   0x7   :  { %41 = dma.hbm_to_vmem [thread:$0]  %s34_s23, 1024, %s36_s25, [#allocation6], %s2961_s29, %s2961_s29, %s2962_s30  }
   0x8   :  { %s2963_s7 = smov [#allocation8]   ;;  %s2964_s9 = smov 128  }
   0x9   :  { %s61_s8 = sshll.u32 %s2963_s7, 4  ;;  %s2965_s1 = smov 8   ;;  %s62_s8 = int_to_ptr.vmem [resolvable:$true] %s61_s8 }
   0xa   :  { %67 = dma.hbm_to_vmem [thread:$0]  %s60_s28, 2048, %s62_s8, [#allocation9], %s2964_s9, %s2964_s9, %s2965_s1  }
   0xb   :  { %s20_s12 = sshll.u32 %s4455_s0, 4  ;;  %s2966_s13 = smov [#allocation2]   ;;  %s21_s12 = int_to_ptr.hbm [resolvable:$true] %s20_s12 }
   0xc   :  { %s22_s3 = sshll.u32 %s2966_s13, 4  ;;  %s46_s16 = sshll.u32 %s4457_s2, 4  ;;  %s23_s3 = int_to_ptr.vmem [resolvable:$true] %s22_s3  ;;  %s47_s16 = int_to_ptr.hbm [resolvable:$true] %s46_s16 }
   0xd   :  { %28 = dma.hbm_to_vmem [thread:$0]  %s21_s12, 2048, %s23_s3, [#allocation3], %s2961_s29, %s2961_s29, %s2962_s30  }
   0xe   :  { %s2967_s17 = smov [#allocation7]   ;;  %s72_s21 = sshll.u32 %s4459_s4, 4  ;;  %s73_s21 = int_to_ptr.hbm [resolvable:$true] %s72_s21 }
   0xf   :  { %s48_s18 = sshll.u32 %s2967_s17, 4  ;;  %s86_s2 = sshll.u32 %s4460_s5, 4  ;;  %s49_s18 = int_to_ptr.vmem [resolvable:$true] %s48_s18  ;;  %s87_s2 = int_to_ptr.hbm [resolvable:$true] %s86_s2 }
  0x10   :  { %54 = dma.hbm_to_vmem [thread:$0]  %s47_s16, 1024, %s49_s18, [#allocation6], %s2961_s29, %s2961_s29, %s2962_s30  }
  0x11   :  { %s2968_s23 = smov [#allocation10]   ;;  %s2969_s25 = smov [#allocation11]  }
  0x12   :  { %s74_s24 = sshll.u32 %s2968_s23, 4  ;;  %s88_s4 = sshll.u32 %s2969_s25, 4  ;;  %s75_s24 = int_to_ptr.vmem [resolvable:$true] %s74_s24  ;;  %s89_s4 = int_to_ptr.vmem [resolvable:$true] %s88_s4 }
  0x13   :  { %80 = dma.hbm_to_vmem [thread:$0]  %s73_s21, 2048, %s75_s24, [#allocation9], %s2961_s29, %s2961_s29, %s2962_s30  }
  0x14   :  { %91 = dma.hbm_to_vmem [thread:$0]  %s87_s2, 128, %s89_s4, [#allocation12]  }
  0x15   :  { %2950 = dma.done.wait [#allocation3], 2048  }
  0x16   :  { %2951 = vsyncadd [#allocation3], 4294965248 }
  0x17   :  { %2952 = dma.done.wait [#allocation6], 2048  }
  0x18   :  { %2953 = vsyncadd [#allocation6], 4294965248 }
  0x19   :  { %2954 = dma.done.wait [#allocation9], 4096  }
  0x1a   :  { %2955 = vsyncadd [#allocation9], 4294963200 }
  0x1b   :  { %2956 = dma.done.wait [#allocation12], 128  }
  0x1c   :  { %2957 = vsyncadd [#allocation12], 4294967168  ;;  %v2547_v0 = vld [vmem:[#allocation5 + $0x38] sm:$0xff]  ;;  %v2546_v1 = vld [vmem:[#allocation5 + $0x30] sm:$0xff]  ;;  %vm1435_vm8 = vcmask 1040384   ;;  %s2970_s5 = smov [#allocation13]  }
  0x1d   :  { %317 = vmatpush.bf16.msra.mxu0 %v2547_v0  ;;  %2683 = vmatpush.bf16.msra.mxu2 %v2547_v0  ;;  %v2545_v2 = vld [vmem:[#allocation5 + $0x28] sm:$0xff]  ;;  %v2544_v3 = vld [vmem:[#allocation5 + $0x20] sm:$0xff]  ;;  %v2543_v4 = vld [vmem:[#allocation5 + $0x18] sm:$0xff]  ;;  %s2250_s26 = sshll.u32 %s2970_s5, 4  ;;  %s2252_s7 = sshll.u32 %s4461_s6, 4  ;;  %s2251_s26 = int_to_ptr.vmem [resolvable:$true] %s2250_s26  ;;  %s2253_s7 = int_to_ptr.hbm [resolvable:$true] %s2252_s7 }
  0x1e   :  { %v2542_v5 = vld [vmem:[#allocation5 + $0x10] sm:$0xff]  ;;  %v2541_v6 = vld [vmem:[#allocation5 + $0x8] sm:$0xff]  ;;  %v2540_v7 = vld [vmem:[#allocation5] sm:$0xff] }
  0x1f   :  { %v2524_v8 = vld [vmem:[#allocation2] sm:$0xff]  ;;  %v2525_v10 = vld [vmem:[#allocation2 + $0x8] sm:$0xff]  ;;  %v2526_v12 = vld [vmem:[#allocation2 + $0x10] sm:$0xff] }
  0x20   :  { %v2532_v9 = vld [vmem:[#allocation2 + $0x40] sm:$0xff]  ;;  %v2533_v11 = vld [vmem:[#allocation2 + $0x48] sm:$0xff]  ;;  %v2534_v13 = vld [vmem:[#allocation2 + $0x50] sm:$0xff] }
  0x21   :  { %318 = vmatpush.bf16.msra.mxu0 %v2546_v1  ;;  %2684 = vmatpush.bf16.msra.mxu2 %v2546_v1  ;;  %v2527_v14 = vld [vmem:[#allocation2 + $0x18] sm:$0xff]  ;;  %v2528_v16 = vld [vmem:[#allocation2 + $0x20] sm:$0xff]  ;;  %v2529_v19 = vld [vmem:[#allocation2 + $0x28] sm:$0xff] }
  0x22   :  { %v2535_v15 = vld [vmem:[#allocation2 + $0x58] sm:$0xff]  ;;  %v2536_v17 = vld [vmem:[#allocation2 + $0x60] sm:$0xff]  ;;  %v2537_v20 = vld [vmem:[#allocation2 + $0x68] sm:$0xff] }
  0x23   :  { %v2555_v18 = vld [vmem:[#allocation7 + $0x38] sm:$0xff]  ;;  %v2554_v21 = vld [vmem:[#allocation7 + $0x30] sm:$0xff]  ;;  %v2553_v22 = vld [vmem:[#allocation7 + $0x28] sm:$0xff] }
  0x24   :  { %550 = vmatpush.bf16.msra.mxu1 %v2555_v18  ;;  %2691 = vmatpush.bf16.msra.mxu3 %v2555_v18  ;;  %v2552_v23 = vld [vmem:[#allocation7 + $0x20] sm:$0xff]  ;;  %v2530_v24 = vld [vmem:[#allocation2 + $0x30] sm:$0xff]  ;;  %v2551_v26 = vld [vmem:[#allocation7 + $0x18] sm:$0xff] }
  0x25   :  { %319 = vmatpush.bf16.msra.mxu0 %v2545_v2  ;;  %2685 = vmatpush.bf16.msra.mxu2 %v2545_v2  ;;  %v2538_v25 = vld [vmem:[#allocation2 + $0x70] sm:$0xff]  ;;  %v2549_v28 = vld [vmem:[#allocation7 + $0x8] sm:$0xff]  ;;  %v2548_v29 = vld [vmem:[#allocation7] sm:$0xff] }
  0x26   :  { %v2550_v27 = vld [vmem:[#allocation7 + $0x10] sm:$0xff]  ;;  %v2531_v30 = vld [vmem:[#allocation2 + $0x38] sm:$0xff]  ;;  %v3036_v33 = vld [vmem:[#allocation11] ss:$0 sm:$0xff] }
  0x27   :  { %v2539_v31 = vld [vmem:[#allocation2 + $0x78] sm:$0xff] }
  0x28   :  { %551 = vmatpush.bf16.msra.mxu1 %v2554_v21  ;;  %2692 = vmatpush.bf16.msra.mxu3 %v2554_v21 }
  0x29   :  { %320 = vmatpush.bf16.msra.mxu0 %v2544_v3  ;;  %2686 = vmatpush.bf16.msra.mxu2 %v2544_v3 }
  0x2c   :  { %552 = vmatpush.bf16.msra.mxu1 %v2553_v22  ;;  %2693 = vmatpush.bf16.msra.mxu3 %v2553_v22 }
  0x2d   :  { %321 = vmatpush.bf16.msra.mxu0 %v2543_v4  ;;  %2687 = vmatpush.bf16.msra.mxu2 %v2543_v4 }
  0x30   :  { %553 = vmatpush.bf16.msra.mxu1 %v2552_v23  ;;  %2694 = vmatpush.bf16.msra.mxu3 %v2552_v23 }
  0x31   :  { %322 = vmatpush.bf16.msra.mxu0 %v2542_v5  ;;  %2688 = vmatpush.bf16.msra.mxu2 %v2542_v5 }
  0x34   :  { %554 = vmatpush.bf16.msra.mxu1 %v2551_v26  ;;  %2695 = vmatpush.bf16.msra.mxu3 %v2551_v26 }
  0x35   :  { %323 = vmatpush.bf16.msra.mxu0 %v2541_v6  ;;  %2689 = vmatpush.bf16.msra.mxu2 %v2541_v6 }
  0x38   :  { %555 = vmatpush.bf16.msra.mxu1 %v2550_v27  ;;  %2696 = vmatpush.bf16.msra.mxu3 %v2550_v27 }
  0x39   :  { %324 = vmatpush.bf16.msra.mxu0 %v2540_v7  ;;  %2690 = vmatpush.bf16.msra.mxu2 %v2540_v7 }
  0x3c   :  { %325 = vmatmul.bf16.vlgmr.msra.gmra.mxu0 %v2524_v8  ;;  %365 = vmatmul.bf16.vlgmr.msra.gmra.mxu2 %v2532_v9 }
  0x3d   :  { %556 = vmatpush.bf16.msra.mxu1 %v2549_v28  ;;  %2697 = vmatpush.bf16.msra.mxu3 %v2549_v28 }
  0x41   :  { %557 = vmatpush.bf16.msra.mxu1 %v2548_v29  ;;  %2698 = vmatpush.bf16.msra.mxu3 %v2548_v29 }
  0x4c   :  { %330 = vmatmul.bf16.gmra.mxu0 %v2525_v10  ;;  %370 = vmatmul.bf16.gmra.mxu2 %v2533_v11 }
  0x5c   :  { %335 = vmatmul.bf16.gmra.mxu0 %v2526_v12  ;;  %375 = vmatmul.bf16.gmra.mxu2 %v2534_v13 }
  0x6c   :  { %340 = vmatmul.bf16.gmra.mxu0 %v2527_v14  ;;  %380 = vmatmul.bf16.gmra.mxu2 %v2535_v15 }
  0x7c   :  { %345 = vmatmul.bf16.gmra.mxu0 %v2528_v16  ;;  %385 = vmatmul.bf16.gmra.mxu2 %v2536_v17 }
  0x8c   :  { %350 = vmatmul.bf16.gmra.mxu0 %v2529_v19  ;;  %390 = vmatmul.bf16.gmra.mxu2 %v2537_v20 }
  0x9c   :  { %355 = vmatmul.bf16.gmra.mxu0 %v2530_v24  ;;  %395 = vmatmul.bf16.gmra.mxu2 %v2538_v25 }
  0xac   :  { %360 = vmatmul.bf16.gmra.mxu0 %v2531_v30  ;;  %400 = vmatmul.bf16.gmra.mxu2 %v2539_v31 }
  0xb9   :  { %v326_v32 = vpop.f32.mrf.mxu0 }
  0xba   :  { %v327_v34 = vadd.f32 %v3036_v33, %v326_v32 }
  0xbc   :  { %v406_v37 = vmul.f32 0.2, %v327_v34 }
  0xbe   :  { %v438_v41 = vmax.f32 %v327_v34, %v406_v37 }
  0xbf   :  { %v366_v35 = vpop.f32.mrf.mxu2 }
  0xc0   :  { %v367_v39 = vadd.f32 %v3036_v33, %v366_v35 }
  0xc1   :  { %v328_v36 = vpop.f32.mrf.mxu0 }
  0xc2   :  { %v329_v38 = vadd.f32 %v3036_v33, %v328_v36  ;;  %v422_v42 = vmul.f32 0.2, %v367_v39 }
  0xc4   :  { %v407_v40 = vmul.f32 0.2, %v329_v38  ;;  %v454_v48 = vmax.f32 %v367_v39, %v422_v42 }
  0xc6   :  { %v439_v43 = vmax.f32 %v329_v38, %v407_v40 }
  0xc7   :  { %v368_v44 = vpop.f32.mrf.mxu2 }
  0xc8   :  { %v369_v45 = vadd.f32 %v3036_v33, %v368_v44  ;;  %v470_v46 = vpack.c.bf16 %v439_v43, %v438_v41 }
  0xc9   :  { %v331_v47 = vpop.f32.mrf.mxu0 }
  0xca   :  { %v423_v49 = vmul.f32 0.2, %v369_v45  ;;  %558 = vmatmul.bf16.vlgmr.msra.gmra.mxu1 %v470_v46  ;;  %v332_v51 = vadd.f32 %v3036_v33, %v331_v47 }
  0xcc   :  { %v455_v50 = vmax.f32 %v369_v45, %v423_v49  ;;  %v408_v55 = vmul.f32 0.2, %v332_v51 }
  0xce   :  { %v478_v52 = vpack.c.bf16 %v455_v50, %v454_v48  ;;  %v440_v59 = vmax.f32 %v332_v51, %v408_v55 }
  0xcf   :  { %v371_v53 = vpop.f32.mrf.mxu2 }
  0xd0   :  { %598 = vmatmul.bf16.vlgmr.msra.gmra.mxu3 %v478_v52  ;;  %v372_v57 = vadd.f32 %v3036_v33, %v371_v53 }
  0xd1   :  { %v333_v54 = vpop.f32.mrf.mxu0 }
  0xd2   :  { %v334_v56 = vadd.f32 %v3036_v33, %v333_v54  ;;  %v424_v60 = vmul.f32 0.2, %v372_v57 }
  0xd4   :  { %v409_v58 = vmul.f32 0.2, %v334_v56  ;;  %v456_v2 = vmax.f32 %v372_v57, %v424_v60 }
  0xd6   :  { %v441_v61 = vmax.f32 %v334_v56, %v409_v58 }
  0xd7   :  { %v373_v62 = vpop.f32.mrf.mxu2 }
  0xd8   :  { %v374_v63 = vadd.f32 %v3036_v33, %v373_v62  ;;  %v471_v0 = vpack.c.bf16 %v441_v61, %v440_v59 }
  0xd9   :  { %v336_v1 = vpop.f32.mrf.mxu0 }
  0xda   :  { %v425_v3 = vmul.f32 0.2, %v374_v63  ;;  %563 = vmatmul.bf16.gmra.mxu1 %v471_v0  ;;  %v337_v5 = vadd.f32 %v3036_v33, %v336_v1 }
  0xdc   :  { %v457_v4 = vmax.f32 %v374_v63, %v425_v3  ;;  %v410_v9 = vmul.f32 0.2, %v337_v5 }
  0xde   :  { %v479_v6 = vpack.c.bf16 %v457_v4, %v456_v2  ;;  %v442_v13 = vmax.f32 %v337_v5, %v410_v9 }
  0xdf   :  { %v376_v7 = vpop.f32.mrf.mxu2 }
  0xe0   :  { %603 = vmatmul.bf16.gmra.mxu3 %v479_v6  ;;  %v377_v11 = vadd.f32 %v3036_v33, %v376_v7 }
  0xe1   :  { %v338_v8 = vpop.f32.mrf.mxu0 }
  0xe2   :  { %v339_v10 = vadd.f32 %v3036_v33, %v338_v8  ;;  %v426_v14 = vmul.f32 0.2, %v377_v11 }
  0xe4   :  { %v411_v12 = vmul.f32 0.2, %v339_v10  ;;  %v458_v20 = vmax.f32 %v377_v11, %v426_v14 }
  0xe6   :  { %v443_v15 = vmax.f32 %v339_v10, %v411_v12 }
  0xe7   :  { %v378_v16 = vpop.f32.mrf.mxu2 }
  0xe8   :  { %v379_v17 = vadd.f32 %v3036_v33, %v378_v16  ;;  %v472_v18 = vpack.c.bf16 %v443_v15, %v442_v13 }
  0xe9   :  { %v341_v19 = vpop.f32.mrf.mxu0 }
  0xea   :  { %v427_v21 = vmul.f32 0.2, %v379_v17  ;;  %568 = vmatmul.bf16.gmra.mxu1 %v472_v18  ;;  %v342_v23 = vadd.f32 %v3036_v33, %v341_v19 }
  0xec   :  { %v459_v22 = vmax.f32 %v379_v17, %v427_v21  ;;  %v412_v27 = vmul.f32 0.2, %v342_v23 }
  0xee   :  { %v480_v24 = vpack.c.bf16 %v459_v22, %v458_v20  ;;  %v444_v31 = vmax.f32 %v342_v23, %v412_v27 }
  0xef   :  { %v381_v25 = vpop.f32.mrf.mxu2 }
  0xf0   :  { %608 = vmatmul.bf16.gmra.mxu3 %v480_v24  ;;  %v382_v29 = vadd.f32 %v3036_v33, %v381_v25 }
  0xf1   :  { %v343_v26 = vpop.f32.mrf.mxu0 }
  0xf2   :  { %v344_v28 = vadd.f32 %v3036_v33, %v343_v26  ;;  %v428_v32 = vmul.f32 0.2, %v382_v29 }
  0xf4   :  { %v413_v30 = vmul.f32 0.2, %v344_v28  ;;  %v460_v39 = vmax.f32 %v382_v29, %v428_v32 }
  0xf6   :  { %v445_v34 = vmax.f32 %v344_v28, %v413_v30 }
  0xf7   :  { %v383_v35 = vpop.f32.mrf.mxu2 }
  0xf8   :  { %v384_v36 = vadd.f32 %v3036_v33, %v383_v35  ;;  %v473_v37 = vpack.c.bf16 %v445_v34, %v444_v31 }
  0xf9   :  { %v346_v38 = vpop.f32.mrf.mxu0 }
  0xfa   :  { %v429_v40 = vmul.f32 0.2, %v384_v36  ;;  %573 = vmatmul.bf16.gmra.mxu1 %v473_v37  ;;  %v347_v42 = vadd.f32 %v3036_v33, %v346_v38 }
  0xfc   :  { %v461_v41 = vmax.f32 %v384_v36, %v429_v40  ;;  %v414_v46 = vmul.f32 0.2, %v347_v42 }
  0xfe   :  { %v481_v43 = vpack.c.bf16 %v461_v41, %v460_v39  ;;  %v446_v50 = vmax.f32 %v347_v42, %v414_v46 }
  0xff   :  { %v386_v44 = vpop.f32.mrf.mxu2 }
 0x100   :  { %613 = vmatmul.bf16.gmra.mxu3 %v481_v43  ;;  %v387_v48 = vadd.f32 %v3036_v33, %v386_v44 }
 0x101   :  { %v348_v45 = vpop.f32.mrf.mxu0 }
 0x102   :  { %v349_v47 = vadd.f32 %v3036_v33, %v348_v45  ;;  %v430_v51 = vmul.f32 0.2, %v387_v48 }
 0x104   :  { %v415_v49 = vmul.f32 0.2, %v349_v47  ;;  %v462_v57 = vmax.f32 %v387_v48, %v430_v51 }
 0x106   :  { %v447_v52 = vmax.f32 %v349_v47, %v415_v49 }
 0x107   :  { %v388_v53 = vpop.f32.mrf.mxu2 }
 0x108   :  { %v389_v54 = vadd.f32 %v3036_v33, %v388_v53  ;;  %v474_v55 = vpack.c.bf16 %v447_v52, %v446_v50 }
 0x109   :  { %v351_v56 = vpop.f32.mrf.mxu0 }
 0x10a   :  { %v431_v58 = vmul.f32 0.2, %v389_v54  ;;  %578 = vmatmul.bf16.gmra.mxu1 %v474_v55  ;;  %v352_v60 = vadd.f32 %v3036_v33, %v351_v56 }
 0x10c   :  { %v463_v59 = vmax.f32 %v389_v54, %v431_v58  ;;  %v416_v0 = vmul.f32 0.2, %v352_v60 }
 0x10e   :  { %v482_v61 = vpack.c.bf16 %v463_v59, %v462_v57  ;;  %v448_v4 = vmax.f32 %v352_v60, %v416_v0  ;;  %v2454_v0 = vld [vmem:[#allocation8 + $0x70] sm:$0xf] }
 0x10f   :  { %v391_v62 = vpop.f32.mrf.mxu2 }
 0x110   :  { %618 = vmatmul.bf16.gmra.mxu3 %v482_v61  ;;  %v392_v2 = vadd.f32 %v3036_v33, %v391_v62  ;;  %v2570_v62 = vld [vmem:[#allocation8 + $0x74] sm:$0xf] }
 0x111   :  { %v353_v63 = vpop.f32.mrf.mxu0 }
 0x112   :  { %v354_v1 = vadd.f32 %v3036_v33, %v353_v63  ;;  %v432_v5 = vmul.f32 0.2, %v392_v2  ;;  %v2456_v63 = vld [vmem:[#allocation8 + $0x78] sm:$0xf0] }
 0x114   :  { %v417_v3 = vmul.f32 0.2, %v354_v1  ;;  %v464_v11 = vmax.f32 %v392_v2, %v432_v5  ;;  %v2459_v2 = vor.u32 %v2570_v62, %v2456_v63 }
 0x116   :  { %v449_v6 = vmax.f32 %v354_v1, %v417_v3  ;;  %v2571_v3 = vld [vmem:[#allocation8 + $0x74] sm:$0xf0]  ;;  %1099 = vmatpush.bf16.msrb.mxu3 %v2459_v2 }
 0x117   :  { %v393_v7 = vpop.f32.mrf.mxu2 }
 0x118   :  { %v394_v8 = vadd.f32 %v3036_v33, %v393_v7  ;;  %v475_v9 = vpack.c.bf16 %v449_v6, %v448_v4  ;;  %v2455_v4 = vor.u32 %v2571_v3, %v2454_v0 }
 0x119   :  { %v356_v10 = vpop.f32.mrf.mxu0 }
 0x11a   :  { %v433_v12 = vmul.f32 0.2, %v394_v8  ;;  %583 = vmatmul.bf16.gmra.mxu1 %v475_v9  ;;  %v357_v14 = vadd.f32 %v3036_v33, %v356_v10  ;;  %1010 = vmatpush.bf16.msrb.mxu2 %v2455_v4  ;;  %v2448_v9 = vld [vmem:[#allocation8 + $0x68] sm:$0xf0]  ;;  %v2446_v10 = vld [vmem:[#allocation8 + $0x60] sm:$0xf] }
 0x11c   :  { %v465_v13 = vmax.f32 %v394_v8, %v433_v12  ;;  %v418_v18 = vmul.f32 0.2, %v357_v14  ;;  %v2568_v8 = vld [vmem:[#allocation8 + $0x64] sm:$0xf]  ;;  %v2569_v12 = vld [vmem:[#allocation8 + $0x64] sm:$0xf0] }
 0x11e   :  { %v483_v15 = vpack.c.bf16 %v465_v13, %v464_v11  ;;  %v450_v22 = vmax.f32 %v357_v14, %v418_v18  ;;  %v2451_v11 = vor.u32 %v2568_v8, %v2448_v9  ;;  %v2447_v13 = vor.u32 %v2569_v12, %v2446_v10  ;;  %v2566_v18 = vld [vmem:[#allocation8 + $0x54] sm:$0xf] }
 0x11f   :  { %v396_v16 = vpop.f32.mrf.mxu2 }
 0x120   :  { %623 = vmatmul.bf16.gmra.mxu3 %v483_v15  ;;  %v397_v20 = vadd.f32 %v3036_v33, %v396_v16  ;;  %1011 = vmatpush.bf16.msrb.mxu2 %v2447_v13 }
 0x121   :  { %v358_v17 = vpop.f32.mrf.mxu0  ;;  %1100 = vmatpush.bf16.msrb.mxu3 %v2451_v11 }
 0x122   :  { %v359_v19 = vadd.f32 %v3036_v33, %v358_v17  ;;  %v434_v23 = vmul.f32 0.2, %v397_v20 }
 0x124   :  { %v419_v21 = vmul.f32 0.2, %v359_v19  ;;  %v466_v29 = vmax.f32 %v397_v20, %v434_v23  ;;  %v2438_v20 = vld [vmem:[#allocation8 + $0x50] sm:$0xf] }
 0x126   :  { %v451_v24 = vmax.f32 %v359_v19, %v419_v21  ;;  %v2440_v19 = vld [vmem:[#allocation8 + $0x58] sm:$0xf0] }
 0x127   :  { %v398_v25 = vpop.f32.mrf.mxu2  ;;  %v2443_v21 = vor.u32 %v2566_v18, %v2440_v19 }
 0x128   :  { %v399_v26 = vadd.f32 %v3036_v33, %v398_v25  ;;  %v476_v27 = vpack.c.bf16 %v451_v24, %v450_v22  ;;  %v2567_v22 = vld [vmem:[#allocation8 + $0x54] sm:$0xf0] }
 0x129   :  { %v361_v28 = vpop.f32.mrf.mxu0  ;;  %v2439_v23 = vor.u32 %v2567_v22, %v2438_v20  ;;  %1101 = vmatpush.bf16.msrb.mxu3 %v2443_v21 }
 0x12a   :  { %v435_v30 = vmul.f32 0.2, %v399_v26  ;;  %588 = vmatmul.bf16.gmra.mxu1 %v476_v27  ;;  %v362_v32 = vadd.f32 %v3036_v33, %v361_v28 }
 0x12b   :  { %1012 = vmatpush.bf16.msrb.mxu2 %v2439_v23 }
 0x12c   :  { %v467_v31 = vmax.f32 %v399_v26, %v435_v30  ;;  %v420_v37 = vmul.f32 0.2, %v362_v32 }
 0x12e   :  { %v484_v34 = vpack.c.bf16 %v467_v31, %v466_v29  ;;  %v452_v41 = vmax.f32 %v362_v32, %v420_v37 }
 0x12f   :  { %v401_v35 = vpop.f32.mrf.mxu2 }
 0x130   :  { %628 = vmatmul.bf16.gmra.mxu3 %v484_v34  ;;  %v402_v39 = vadd.f32 %v3036_v33, %v401_v35 }
 0x131   :  { %v363_v36 = vpop.f32.mrf.mxu0 }
 0x132   :  { %v364_v38 = vadd.f32 %v3036_v33, %v363_v36  ;;  %v436_v42 = vmul.f32 0.2, %v402_v39 }
 0x134   :  { %v421_v40 = vmul.f32 0.2, %v364_v38  ;;  %v468_v47 = vmax.f32 %v402_v39, %v436_v42 }
 0x136   :  { %v453_v43 = vmax.f32 %v364_v38, %v421_v40 }
 0x137   :  { %v403_v44 = vpop.f32.mrf.mxu2 }
 0x138   :  { %v404_v45 = vadd.f32 %v3036_v33, %v403_v44  ;;  %v477_v46 = vpack.c.bf16 %v453_v43, %v452_v41 }
 0x13a   :  { %v437_v48 = vmul.f32 0.2, %v404_v45  ;;  %593 = vmatmul.bf16.gmra.mxu1 %v477_v46 }
 0x13c   :  { %v469_v49 = vmax.f32 %v404_v45, %v437_v48 }
 0x13e   :  { %v485_v50 = vpack.c.bf16 %v469_v49, %v468_v47 }
 0x140   :  { %633 = vmatmul.bf16.gmra.mxu3 %v485_v50 }
 0x147   :  { %v3070_v51 = vpop.f32.mrf.mxu1 }
 0x148   :  { %v677_v27 = vmul.f32 %v3070_v51, %v3070_v51 }
 0x14f   :  { %v3072_v52 = vpop.f32.mrf.mxu1 }
 0x150   :  { %v678_v26 = vmul.f32 %v3072_v52, %v3072_v52  ;;  %v639_v28 = vadd.f32 %v3072_v52, %v3070_v51 }
 0x152   :  { %v709_v31 = vadd.f32 %v678_v26, %v677_v27 }
 0x153   :  { %v3074_v53 = vpop.f32.mrf.mxu3 }
 0x157   :  { %v3076_v54 = vpop.f32.mrf.mxu1 }
 0x158   :  { %v679_v29 = vmul.f32 %v3076_v54, %v3076_v54  ;;  %v640_v30 = vadd.f32 %v639_v28, %v3076_v54 }
 0x15a   :  { %v710_v35 = vadd.f32 %v709_v31, %v679_v29 }
 0x15b   :  { %v3078_v55 = vpop.f32.mrf.mxu3 }
 0x15f   :  { %v3080_v56 = vpop.f32.mrf.mxu1 }
 0x160   :  { %v680_v32 = vmul.f32 %v3080_v56, %v3080_v56  ;;  %v641_v36 = vadd.f32 %v640_v30, %v3080_v56 }
 0x162   :  { %v711_v39 = vadd.f32 %v710_v35, %v680_v32 }
 0x163   :  { %v3082_v33 = vpop.f32.mrf.mxu3 }
 0x167   :  { %v3084_v57 = vpop.f32.mrf.mxu1 }
 0x168   :  { %v681_v37 = vmul.f32 %v3084_v57, %v3084_v57  ;;  %v642_v38 = vadd.f32 %v641_v36, %v3084_v57 }
 0x16a   :  { %v712_v42 = vadd.f32 %v711_v39, %v681_v37  ;;  %v2432_v39 = vld [vmem:[#allocation8 + $0x48] sm:$0xf0] }
 0x16b   :  { %v3086_v58 = vpop.f32.mrf.mxu3 }
 0x16f   :  { %v3088_v59 = vpop.f32.mrf.mxu1 }
 0x170   :  { %v682_v40 = vmul.f32 %v3088_v59, %v3088_v59  ;;  %v643_v43 = vadd.f32 %v642_v38, %v3088_v59  ;;  %v2564_v38 = vld [vmem:[#allocation8 + $0x44] sm:$0xf] }
 0x172   :  { %v713_v46 = vadd.f32 %v712_v42, %v682_v40  ;;  %v2430_v40 = vld [vmem:[#allocation8 + $0x40] sm:$0xf]  ;;  %v2435_v42 = vor.u32 %v2564_v38, %v2432_v39 }
 0x173   :  { %v3090_v60 = vpop.f32.mrf.mxu3 }
 0x174   :  { %1102 = vmatpush.bf16.msrb.mxu3 %v2435_v42 }
 0x177   :  { %v3092_v61 = vpop.f32.mrf.mxu1 }
 0x178   :  { %v683_v44 = vmul.f32 %v3092_v61, %v3092_v61  ;;  %v644_v45 = vadd.f32 %v643_v43, %v3092_v61  ;;  %v2565_v43 = vld [vmem:[#allocation8 + $0x44] sm:$0xf0] }
 0x17a   :  { %v714_v49 = vadd.f32 %v713_v46, %v683_v44  ;;  %v693_v44 = vmul.f32 %v3074_v53, %v3074_v53 }
 0x17b   :  { %v3094_v1 = vpop.f32.mrf.mxu3 }
 0x17f   :  { %v3096_v5 = vpop.f32.mrf.mxu1 }
 0x180   :  { %v684_v47 = vmul.f32 %v3096_v5, %v3096_v5  ;;  %v645_v50 = vadd.f32 %v644_v45, %v3096_v5 }
 0x182   :  { %v715_v0 = vadd.f32 %v714_v49, %v684_v47  ;;  %v2431_v47 = vor.u32 %v2565_v43, %v2430_v40  ;;  %v694_v49 = vmul.f32 %v3078_v55, %v3078_v55 }
 0x183   :  { %v3098_v6 = vpop.f32.mrf.mxu3 }
 0x184   :  { %1013 = vmatpush.bf16.msrb.mxu2 %v2431_v47 }
 0x187   :  { %v3100_v7 = vpop.f32.mrf.mxu1 }
 0x188   :  { %v685_v62 = vmul.f32 %v3100_v7, %v3100_v7  ;;  %v646_v63 = vadd.f32 %v645_v50, %v3100_v7 }
 0x18a   :  { %v716_v3 = vadd.f32 %v715_v0, %v685_v62 }
 0x18b   :  { %v3102_v14 = vpop.f32.mrf.mxu3 }
 0x18f   :  { %v3104_v15 = vpop.f32.mrf.mxu1 }
 0x190   :  { %v686_v2 = vmul.f32 %v3104_v15, %v3104_v15  ;;  %v647_v4 = vadd.f32 %v646_v63, %v3104_v15  ;;  %v695_v63 = vmul.f32 %v3082_v33, %v3082_v33 }
 0x192   :  { %v717_v11 = vadd.f32 %v716_v3, %v686_v2  ;;  %v696_v3 = vmul.f32 %v3086_v58, %v3086_v58 }
 0x193   :  { %v3106_v16 = vpop.f32.mrf.mxu3 }
 0x197   :  { %v3108_v17 = vpop.f32.mrf.mxu1 }
 0x198   :  { %v687_v8 = vmul.f32 %v3108_v17, %v3108_v17  ;;  %v648_v10 = vadd.f32 %v647_v4, %v3108_v17 }
 0x19a   :  { %v718_v18 = vadd.f32 %v717_v11, %v687_v8  ;;  %v697_v11 = vmul.f32 %v3090_v60, %v3090_v60 }
 0x19b   :  { %v3112_v25 = vpop.f32.mrf.mxu3 }
 0x19c   :  { %v702_v38 = vmul.f32 %v3112_v25, %v3112_v25 }
 0x19f   :  { %v3110_v24 = vpop.f32.mrf.mxu1 }
 0x1a0   :  { %v688_v12 = vmul.f32 %v3110_v24, %v3110_v24  ;;  %v649_v19 = vadd.f32 %v648_v10, %v3110_v24 }
 0x1a2   :  { %v719_v22 = vadd.f32 %v718_v18, %v688_v12 }
 0x1a3   :  { %v3133_v41 = vpop.f32.mrf.mxu3 }
 0x1a4   :  { %v703_v42 = vmul.f32 %v3133_v41, %v3133_v41 }
 0x1a7   :  { %v3125_v34 = vpop.f32.mrf.mxu1 }
 0x1a8   :  { %v689_v20 = vmul.f32 %v3125_v34, %v3125_v34  ;;  %v650_v21 = vadd.f32 %v649_v19, %v3125_v34  ;;  %v698_v19 = vmul.f32 %v3094_v1, %v3094_v1 }
 0x1aa   :  { %v720_v26 = vadd.f32 %v719_v22, %v689_v20  ;;  %v699_v22 = vmul.f32 %v3098_v6, %v3098_v6 }
 0x1ab   :  { %v3152_v9 = vpop.f32.mrf.mxu3 }
 0x1af   :  { %v3141_v48 = vpop.f32.mrf.mxu1 }
 0x1b0   :  { %v690_v23 = vmul.f32 %v3141_v48, %v3141_v48  ;;  %v651_v27 = vadd.f32 %v650_v21, %v3141_v48 }
 0x1b2   :  { %v721_v30 = vadd.f32 %v720_v26, %v690_v23 }
 0x1b3   :  { %v3169_v31 = vpop.f32.mrf.mxu3 }
 0x1b7   :  { %v3157_v13 = vpop.f32.mrf.mxu1 }
 0x1b8   :  { %v691_v28 = vmul.f32 %v3157_v13, %v3157_v13  ;;  %v652_v29 = vadd.f32 %v651_v27, %v3157_v13  ;;  %v700_v27 = vmul.f32 %v3102_v14, %v3102_v14 }
 0x1ba   :  { %v722_v35 = vadd.f32 %v721_v30, %v691_v28  ;;  %v701_v30 = vmul.f32 %v3106_v16, %v3106_v16 }
 0x1bb   :  { %v3188_v10 = vpop.f32.mrf.mxu3 }
 0x1bf   :  { %v3171_v32 = vpop.f32.mrf.mxu1 }
 0x1c0   :  { %v653_v36 = vadd.f32 %v652_v29, %v3171_v32  ;;  %v692_v37 = vmul.f32 %v3171_v32, %v3171_v32 }
 0x1c2   :  { %v654_v45 = vadd.f32 %v653_v36, %v3074_v53  ;;  %v723_v46 = vadd.f32 %v722_v35, %v692_v37 }
 0x1c3   :  { %v3205_v37 = vpop.f32.mrf.mxu3 }
 0x1c4   :  { %v655_v50 = vadd.f32 %v654_v45, %v3078_v55  ;;  %v724_v62 = vadd.f32 %v723_v46, %v693_v44  ;;  %v704_v45 = vmul.f32 %v3152_v9, %v3152_v9 }
 0x1c6   :  { %v656_v0 = vadd.f32 %v655_v50, %v3082_v33  ;;  %v725_v2 = vadd.f32 %v724_v62, %v694_v49  ;;  %v705_v49 = vmul.f32 %v3169_v31, %v3169_v31 }
 0x1c8   :  { %v657_v4 = vadd.f32 %v656_v0, %v3086_v58  ;;  %v726_v8 = vadd.f32 %v725_v2, %v695_v63  ;;  %v706_v63 = vmul.f32 %v3188_v10, %v3188_v10 }
 0x1ca   :  { %v658_v12 = vadd.f32 %v657_v4, %v3090_v60  ;;  %v727_v18 = vadd.f32 %v726_v8, %v696_v3  ;;  %v707_v8 = vmul.f32 %v3205_v37, %v3205_v37 }
 0x1cb   :  { %v3222_v3 = vpop.f32.mrf.mxu3 }
 0x1cc   :  { %v659_v20 = vadd.f32 %v658_v12, %v3094_v1  ;;  %v728_v21 = vadd.f32 %v727_v18, %v697_v11 }
 0x1ce   :  { %v729_v23 = vadd.f32 %v728_v21, %v698_v19  ;;  %v660_v26 = vadd.f32 %v659_v20, %v3098_v6  ;;  %v708_v19 = vmul.f32 %v3222_v3, %v3222_v3 }
 0x1d0   :  { %v661_v28 = vadd.f32 %v660_v26, %v3102_v14  ;;  %v730_v29 = vadd.f32 %v729_v23, %v699_v22 }
 0x1d2   :  { %v662_v35 = vadd.f32 %v661_v28, %v3106_v16  ;;  %v731_v36 = vadd.f32 %v730_v29, %v700_v27 }
 0x1d4   :  { %v663_v39 = vadd.f32 %v662_v35, %v3112_v25  ;;  %v732_v40 = vadd.f32 %v731_v36, %v701_v30 }
 0x1d6   :  { %v664_v43 = vadd.f32 %v663_v39, %v3133_v41  ;;  %v733_v44 = vadd.f32 %v732_v40, %v702_v38 }
 0x1d8   :  { %v665_v46 = vadd.f32 %v664_v43, %v3152_v9  ;;  %v734_v47 = vadd.f32 %v733_v44, %v703_v42  ;;  %v2562_v44 = vld [vmem:[#allocation8 + $0x34] sm:$0xf] }
 0x1da   :  { %v666_v50 = vadd.f32 %v665_v46, %v3169_v31  ;;  %v735_v62 = vadd.f32 %v734_v47, %v704_v45  ;;  %v2424_v45 = vld [vmem:[#allocation8 + $0x38] sm:$0xf0] }
 0x1db   :  { %v2427_v46 = vor.u32 %v2562_v44, %v2424_v45  ;;  %v117_v45 = vld [vmem:[#allocation11 + $0x1] sm:$0x1] }
 0x1dc   :  { %v667_v0 = vadd.f32 %v666_v50, %v3188_v10  ;;  %v736_v2 = vadd.f32 %v735_v62, %v705_v49  ;;  %v2422_v50 = vld [vmem:[#allocation8 + $0x30] sm:$0xf]  ;;  %v2563_v62 = vld [vmem:[#allocation8 + $0x34] sm:$0xf0] }
 0x1dd   :  { %1103 = vmatpush.bf16.msrb.mxu3 %v2427_v46 }
 0x1de   :  { %v668_v4 = vadd.f32 %v667_v0, %v3205_v37  ;;  %v737_v11 = vadd.f32 %v736_v2, %v706_v63  ;;  %v2423_v0 = vor.u32 %v2563_v62, %v2422_v50  ;;  %v2560_v2 = vld [vmem:[#allocation8 + $0x24] sm:$0xf]  ;;  %v118_v50 = vld [vmem:[#allocation11 + $0x2] sm:$0x1] }
 0x1e0   :  { %v738_v12 = vadd.f32 %v737_v11, %v707_v8  ;;  %v669_v18 = vadd.f32 %v668_v4, %v3222_v3  ;;  %1014 = vmatpush.bf16.msrb.mxu2 %v2423_v0  ;;  %v2416_v4 = vld [vmem:[#allocation8 + $0x28] sm:$0xf0]  ;;  %v2414_v8 = vld [vmem:[#allocation8 + $0x20] sm:$0xf] }
 0x1e1   :  { %v2419_v11 = vor.u32 %v2560_v2, %v2416_v4 }
 0x1e2   :  { %v670_v20 = vrot.slane %v669_v18, 4  ;;  %v739_v21 = vadd.f32 %v738_v12, %v708_v19  ;;  %v2561_v12 = vld [vmem:[#allocation8 + $0x24] sm:$0xf0]  ;;  %v2558_v19 = vld [vmem:[#allocation8 + $0x14] sm:$0xf] }
 0x1e3   :  { %1104 = vmatpush.bf16.msrb.mxu3 %v2419_v11 }
 0x1e4   :  { %v671_v22 = vadd.f32 %v670_v20, %v669_v18  ;;  %v740_v23 = vrot.slane %v739_v21, 4  ;;  %v2415_v18 = vor.u32 %v2561_v12, %v2414_v8  ;;  %v2408_v20 = vld [vmem:[#allocation8 + $0x18] sm:$0xf0] }
 0x1e6   :  { %v672_v26 = vrot.slane %v671_v22, 2  ;;  %v741_v27 = vadd.f32 %v740_v23, %v739_v21  ;;  %1015 = vmatpush.bf16.msrb.mxu2 %v2415_v18  ;;  %v2406_v21 = vld [vmem:[#allocation8 + $0x10] sm:$0xf]  ;;  %v2411_v23 = vor.u32 %v2558_v19, %v2408_v20 }
 0x1e8   :  { %v673_v28 = vadd.f32 %v672_v26, %v671_v22  ;;  %v742_v29 = vrot.slane %v741_v27, 2  ;;  %v2559_v26 = vld [vmem:[#allocation8 + $0x14] sm:$0xf0]  ;;  %1105 = vmatpush.bf16.msrb.mxu3 %v2411_v23 }
 0x1ea   :  { %v674_v30 = vrot.slane %v673_v28, 1  ;;  %v743_v35 = vadd.f32 %v742_v29, %v741_v27 }
 0x1ec   :  { %v675_v36 = vadd.f32 %v674_v30, %v673_v28  ;;  %v744_v38 = vrot.slane %v743_v35, 1  ;;  %v2407_v28 = vor.u32 %v2559_v26, %v2406_v21  ;;  %v2556_v30 = vld [vmem:[#allocation8 + $0x4] sm:$0xf] }
 0x1ee   :  { %v676_v39 = vmul.f32 0.00390625, %v675_v36  ;;  %v745_v40 = vadd.f32 %v744_v38, %v743_v35  ;;  %1016 = vmatpush.bf16.msrb.mxu2 %v2407_v28  ;;  %v2400_v35 = vld [vmem:[#allocation8 + $0x8] sm:$0xf0]  ;;  %v2398_v36 = vld [vmem:[#allocation8] sm:$0xf] }
 0x1ef   :  { %v2403_v38 = vor.u32 %v2556_v30, %v2400_v35 }
 0x1f0   :  { %v746_v42 = vmul.f32 0.00390625, %v745_v40  ;;  %v747_v43 = vmul.f32 %v676_v39, %v676_v39  ;;  %v2557_v40 = vld [vmem:[#allocation8 + $0x4] sm:$0xf0] }
 0x1f1   :  { %1106 = vmatpush.bf16.msrb.mxu3 %v2403_v38 }
 0x1f2   :  { %v748_v47 = vsub.f32 %v746_v42, %v747_v43  ;;  %v2399_v43 = vor.u32 %v2557_v40, %v2398_v36 }
 0x1f4   :  { %v749_v49 = vmax.f32 %v748_v47, 0.0  ;;  %1017 = vmatpush.bf16.msrb.mxu2 %v2399_v43 }
 0x1f6   :  { %v750_v63 = vadd.f32 1e-05, %v749_v49 }
 0x1f8   :  { %2712 = vrsqrt.f32 %v750_v63  ;;  %vm757_vm1 = vweird.f32 %v750_v63 }
 0x1fe   :  { %v2713_v22 = vpop.eup %2712 }
 0x1ff   :  { %v752_v27 = vmul.f32 %v2713_v22, %v750_v63  ;;  %vm758_vm0 = vweird.f32 %v2713_v22 }
 0x200   :  { %vm759_vm2 = vmor %vm757_vm1, %vm758_vm0 }
 0x201   :  { %v753_v29 = vmul.f32 %v2713_v22, %v752_v27 }
 0x203   :  { %v754_v42 = vmul.f32 0.5, %v753_v29 }
 0x205   :  { %v755_v44 = vsub.f32 1.5, %v754_v42 }
 0x207   :  { %v756_v46 = vmul.f32 %v2713_v22, %v755_v44 }
 0x209   :  { %v760_v47 = vsel %vm759_vm2, %v2713_v22, %v756_v46 }
 0x20a   :  { %v761_v49 = vmul.f32 %v760_v47, %v117_v45 }
 0x20c   :  { %v762_v62 = vmul.f32 %v761_v49, %v676_v39  ;;  %v3230_v0 = vperm.slane %v761_v49, 0 }
 0x20e   :  { %v763_v2 = vsub.f32 %v118_v50, %v762_v62  ;;  %v798_v4 = vmul.f32 %v3230_v0, %v3222_v3  ;;  %v767_v11 = vmul.f32 %v3230_v0, %v3070_v51  ;;  %v768_v12 = vmul.f32 %v3230_v0, %v3072_v52 }
 0x20f   :  { %v775_v63 = vmul.f32 %v3230_v0, %v3100_v7  ;;  %v776_v39 = vmul.f32 %v3230_v0, %v3104_v15  ;;  %v777_v18 = vmul.f32 %v3230_v0, %v3108_v17  ;;  %v778_v3 = vmul.f32 %v3230_v0, %v3110_v24 }
 0x210   :  { %v3234_v8 = vperm.slane %v763_v2, 0  ;;  %v779_v51 = vmul.f32 %v3230_v0, %v3125_v34  ;;  %v780_v52 = vmul.f32 %v3230_v0, %v3141_v48  ;;  %v781_v7 = vmul.f32 %v3230_v0, %v3157_v13 }
 0x211   :  { %v782_v15 = vmul.f32 %v3230_v0, %v3171_v32  ;;  %v783_v17 = vmul.f32 %v3230_v0, %v3074_v53  ;;  %v784_v24 = vmul.f32 %v3230_v0, %v3078_v55  ;;  %v785_v20 = vmul.f32 %v3230_v0, %v3082_v33 }
 0x212   :  { %v3249_v19 = vadd.f32 %v3234_v8, %v798_v4  ;;  %v786_v34 = vmul.f32 %v3230_v0, %v3086_v58  ;;  %v787_v48 = vmul.f32 %v3230_v0, %v3090_v60  ;;  %v788_v13 = vmul.f32 %v3230_v0, %v3094_v1 }
 0x213   :  { %v789_v32 = vmul.f32 %v3230_v0, %v3098_v6  ;;  %v790_v53 = vmul.f32 %v3230_v0, %v3102_v14  ;;  %v791_v55 = vmul.f32 %v3230_v0, %v3106_v16  ;;  %v792_v33 = vmul.f32 %v3230_v0, %v3112_v25 }
 0x214   :  { %v793_v58 = vmul.f32 %v3230_v0, %v3133_v41  ;;  %v794_v60 = vmul.f32 %v3230_v0, %v3152_v9  ;;  %v795_v1 = vmul.f32 %v3230_v0, %v3169_v31  ;;  %v796_v6 = vmul.f32 %v3230_v0, %v3188_v10 }
 0x215   :  { %v797_v14 = vmul.f32 %v3230_v0, %v3205_v37  ;;  %v802_v16 = vadd.f32 %v3234_v8, %v767_v11  ;;  %v810_v21 = vadd.f32 %v3234_v8, %v775_v63  ;;  %v811_v25 = vadd.f32 %v3234_v8, %v776_v39 }
 0x216   :  { %v812_v41 = vadd.f32 %v3234_v8, %v777_v18  ;;  %v813_v22 = vadd.f32 %v3234_v8, %v778_v3  ;;  %v3295_v9 = vadd.f32 %v3234_v8, %v779_v51  ;;  %v3298_v31 = vadd.f32 %v3234_v8, %v780_v52 }
 0x217   :  { %v3301_v10 = vadd.f32 %v3234_v8, %v781_v7  ;;  %v3304_v37 = vadd.f32 %v3234_v8, %v782_v15  ;;  %v3307_v23 = vadd.f32 %v3234_v8, %v783_v17  ;;  %v3310_v26 = vadd.f32 %v3234_v8, %v784_v24 }
 0x218   :  { %v3313_v27 = vadd.f32 %v3234_v8, %v785_v20  ;;  %v3316_v28 = vadd.f32 %v3234_v8, %v786_v34  ;;  %v3319_v29 = vadd.f32 %v3234_v8, %v787_v48  ;;  %v3322_v30 = vadd.f32 %v3234_v8, %v788_v13 }
 0x219   :  { %v3325_v35 = vadd.f32 %v3234_v8, %v789_v32  ;;  %v3328_v36 = vadd.f32 %v3234_v8, %v790_v53  ;;  %v3331_v38 = vadd.f32 %v3234_v8, %v791_v55  ;;  %v3334_v40 = vadd.f32 %v3234_v8, %v792_v33 }
 0x21a   :  { %v3337_v42 = vadd.f32 %v3234_v8, %v793_v58  ;;  %v3340_v43 = vadd.f32 %v3234_v8, %v794_v60  ;;  %v3343_v44 = vadd.f32 %v3234_v8, %v795_v1  ;;  %v3346_v45 = vadd.f32 %v3234_v8, %v796_v6 }
 0x21b   :  { %v3349_v46 = vadd.f32 %v3234_v8, %v797_v14  ;;  %v803_v47 = vadd.f32 %v3234_v8, %v768_v12  ;;  %v834_v49 = vmul.f32 0.2, %v802_v16  ;;  %v769_v50 = vmul.f32 %v3230_v0, %v3076_v54 }
 0x21c   :  { %v770_v62 = vmul.f32 %v3230_v0, %v3080_v56  ;;  %v842_v2 = vmul.f32 0.2, %v810_v21  ;;  %v844_v63 = vmul.f32 0.2, %v812_v41  ;;  %v846_v39 = vmul.f32 0.2, %v3295_v9 }
 0x21d   :  { %v835_v4 = vmul.f32 0.2, %v803_v47  ;;  %v866_v11 = vmax.f32 %v802_v16, %v834_v49  ;;  %v848_v18 = vmul.f32 0.2, %v3301_v10  ;;  %v3359_v3 = vadd.f32 %v3234_v8, %v769_v50 }
 0x21e   :  { %v850_v12 = vmul.f32 0.2, %v3307_v23  ;;  %v852_v51 = vmul.f32 0.2, %v3313_v27  ;;  %v843_v54 = vmul.f32 0.2, %v811_v25  ;;  %v805_v17 = vadd.f32 %v3234_v8, %v770_v62 }
 0x21f   :  { %v867_v52 = vmax.f32 %v803_v47, %v835_v4  ;;  %v854_v7 = vmul.f32 0.2, %v3319_v29  ;;  %v856_v56 = vmul.f32 0.2, %v3325_v35  ;;  %v858_v15 = vmul.f32 0.2, %v3331_v38 }
 0x220   :  { %v860_v24 = vmul.f32 0.2, %v3337_v42  ;;  %v874_v34 = vmax.f32 %v810_v21, %v842_v2  ;;  %v875_v48 = vmax.f32 %v811_v25, %v843_v54  ;;  %v862_v13 = vmul.f32 0.2, %v3343_v44 }
 0x221   :  { %v898_v20 = vpack.c.bf16 %v867_v52, %v866_v11  ;;  %v864_v32 = vmul.f32 0.2, %v3349_v46  ;;  %v845_v53 = vmul.f32 0.2, %v813_v22  ;;  %v836_v55 = vmul.f32 0.2, %v3359_v3 }
 0x222   :  { %v3371_v33 = vpack.c.bf16 %v875_v48, %v874_v34  ;;  %v876_v58 = vmax.f32 %v812_v41, %v844_v63  ;;  %v847_v60 = vmul.f32 0.2, %v3298_v31  ;;  %v837_v1 = vmul.f32 0.2, %v805_v17 }
 0x223   :  { %1018 = vmatmul.bf16.vlgmr.msrb.gmra.mxu2 %v898_v20  ;;  %1107 = vmatmul.bf16.vlgmr.msrb.gmra.mxu3 %v898_v20  ;;  %v877_v6 = vmax.f32 %v813_v22, %v845_v53  ;;  %v878_v14 = vmax.f32 %v3295_v9, %v846_v39  ;;  %v849_v16 = vmul.f32 0.2, %v3304_v37  ;;  %v880_v25 = vmax.f32 %v3301_v10, %v848_v18 }
 0x224   :  { %v879_v21 = vmax.f32 %v3298_v31, %v847_v60  ;;  %v851_v47 = vmul.f32 0.2, %v3310_v26  ;;  %v882_v49 = vmax.f32 %v3307_v23, %v850_v12  ;;  %v853_v62 = vmul.f32 0.2, %v3316_v28 }
 0x225   :  { %v3380_v50 = vpack.c.bf16 %v877_v6, %v876_v58  ;;  %v881_v41 = vmax.f32 %v3304_v37, %v849_v16  ;;  %v884_v22 = vmax.f32 %v3313_v27, %v852_v51  ;;  %v855_v4 = vmul.f32 0.2, %v3322_v30 }
 0x226   :  { %v904_v2 = vpack.c.bf16 %v879_v21, %v878_v14  ;;  %v883_v9 = vmax.f32 %v3310_v26, %v851_v47  ;;  %v886_v31 = vmax.f32 %v3319_v29, %v854_v7  ;;  %v885_v11 = vmax.f32 %v3316_v28, %v853_v62 }
 0x227   :  { %v905_v10 = vpack.c.bf16 %v881_v41, %v880_v25  ;;  %v857_v23 = vmul.f32 0.2, %v3328_v36  ;;  %v888_v63 = vmax.f32 %v3325_v35, %v856_v56  ;;  %v887_v37 = vmax.f32 %v3322_v30, %v855_v4 }
 0x228   :  { %v906_v39 = vpack.c.bf16 %v883_v9, %v882_v49  ;;  %v859_v18 = vmul.f32 0.2, %v3334_v40  ;;  %v890_v27 = vmax.f32 %v3331_v38, %v858_v15  ;;  %v907_v12 = vpack.c.bf16 %v885_v11, %v884_v22 }
 0x229   :  { %v889_v26 = vmax.f32 %v3328_v36, %v857_v23  ;;  %v861_v51 = vmul.f32 0.2, %v3340_v43  ;;  %v892_v29 = vmax.f32 %v3337_v42, %v860_v24  ;;  %v908_v52 = vpack.c.bf16 %v887_v37, %v886_v31 }
 0x22a   :  { %v891_v28 = vmax.f32 %v3334_v40, %v859_v18  ;;  %v863_v54 = vmul.f32 0.2, %v3346_v45  ;;  %v894_v35 = vmax.f32 %v3343_v44, %v862_v13  ;;  %v865_v38 = vmul.f32 0.2, %v3249_v19 }
 0x22b   :  { %v3400_v7 = vpack.c.bf16 %v889_v26, %v888_v63  ;;  %v893_v30 = vmax.f32 %v3340_v43, %v861_v51  ;;  %v896_v56 = vmax.f32 %v3349_v46, %v864_v32  ;;  %v868_v36 = vmax.f32 %v3359_v3, %v836_v55 }
 0x22c   :  { %v869_v15 = vmax.f32 %v805_v17, %v837_v1  ;;  %v3406_v20 = vpack.c.bf16 %v891_v28, %v890_v27  ;;  %v895_v42 = vmax.f32 %v3346_v45, %v863_v54  ;;  %v897_v24 = vmax.f32 %v3249_v19, %v865_v38 }
 0x22d   :  { %v3409_v40 = vpack.c.bf16 %v893_v30, %v892_v29  ;;  %v771_v48 = vmul.f32 %v3230_v0, %v3084_v57  ;;  %v772_v46 = vmul.f32 %v3230_v0, %v3088_v59  ;;  %v773_v55 = vmul.f32 %v3230_v0, %v3092_v61 }
 0x22e   :  { %v3412_v44 = vpack.c.bf16 %v895_v42, %v894_v35  ;;  %v3414_v34 = vpack.c.bf16 %v897_v24, %v896_v56  ;;  %v899_v43 = vpack.c.bf16 %v869_v15, %v868_v36  ;;  %v774_v57 = vmul.f32 %v3230_v0, %v3096_v5  ;;  %v2579_v42 = vld [vmem:[#allocation10 + $0x38] sm:$0xff] }
 0x22f   :  { %v806_v3 = vadd.f32 %v3234_v8, %v771_v48  ;;  %v807_v45 = vadd.f32 %v3234_v8, %v772_v46  ;;  %v808_v59 = vadd.f32 %v3234_v8, %v773_v55  ;;  %1876 = vmatpush.bf16.msrb.mxu0 %v2579_v42  ;;  %v2578_v48 = vld [vmem:[#allocation10 + $0x30] sm:$0xff]  ;;  %v2585_v55 = vld [vmem:[#allocation10 + $0x68] sm:$0xff] }
 0x230   :  { %v809_v58 = vadd.f32 %v3234_v8, %v774_v57  ;;  %v2586_v46 = vld [vmem:[#allocation10 + $0x70] sm:$0xff] }
 0x231   :  { %v838_v17 = vmul.f32 0.2, %v806_v3  ;;  %v839_v13 = vmul.f32 0.2, %v807_v45  ;;  %v840_v60 = vmul.f32 0.2, %v808_v59 }
 0x232   :  { %v841_v1 = vmul.f32 0.2, %v809_v58 }
 0x233   :  { %1023 = vmatmul.bf16.gmra.mxu2 %v899_v43  ;;  %1112 = vmatmul.bf16.gmra.mxu3 %v899_v43  ;;  %v870_v19 = vmax.f32 %v806_v3, %v838_v17  ;;  %v871_v32 = vmax.f32 %v807_v45, %v839_v13  ;;  %v872_v6 = vmax.f32 %v808_v59, %v840_v60 }
 0x234   :  { %v873_v14 = vmax.f32 %v809_v58, %v841_v1  ;;  %1877 = vmatpush.bf16.msrb.mxu0 %v2578_v48 }
 0x235   :  { %v900_v53 = vpack.c.bf16 %v871_v32, %v870_v19 }
 0x236   :  { %v901_v16 = vpack.c.bf16 %v873_v14, %v872_v6 }
 0x243   :  { %1028 = vmatmul.bf16.gmra.mxu2 %v900_v53  ;;  %1117 = vmatmul.bf16.gmra.mxu3 %v900_v53  ;;  %v2577_v53 = vld [vmem:[#allocation10 + $0x28] sm:$0xff] }
 0x244   :  { %1878 = vmatpush.bf16.msrb.mxu0 %v2577_v53 }
 0x253   :  { %1033 = vmatmul.bf16.gmra.mxu2 %v901_v16  ;;  %1122 = vmatmul.bf16.gmra.mxu3 %v901_v16 }
 0x263   :  { %1038 = vmatmul.bf16.gmra.mxu2 %v3371_v33  ;;  %1127 = vmatmul.bf16.gmra.mxu3 %v3371_v33 }
 0x273   :  { %1043 = vmatmul.bf16.gmra.mxu2 %v3380_v50  ;;  %1132 = vmatmul.bf16.gmra.mxu3 %v3380_v50 }
 0x283   :  { %1048 = vmatmul.bf16.gmra.mxu2 %v904_v2  ;;  %1137 = vmatmul.bf16.gmra.mxu3 %v904_v2 }
 0x293   :  { %1053 = vmatmul.bf16.gmra.mxu2 %v905_v10  ;;  %1142 = vmatmul.bf16.gmra.mxu3 %v905_v10 }
 0x2a3   :  { %1058 = vmatmul.bf16.gmra.mxu2 %v906_v39  ;;  %1147 = vmatmul.bf16.gmra.mxu3 %v906_v39 }
 0x2a6   :  { %v3432_v61 = vpop.f32.mrf.mxu2  ;;  %v3434_v5 = vpop.f32.mrf.mxu3 }
 0x2a7   :  { %v1264_v57 = vmul.f32 %v3432_v61, %v3432_v61  ;;  %v1265_v59 = vmul.f32 %v3434_v5, %v3434_v5 }
 0x2ae   :  { %v3436_v0 = vpop.f32.mrf.mxu2  ;;  %v3438_v8 = vpop.f32.mrf.mxu3 }
 0x2af   :  { %4541 = vst [vmem:[#allocation19_spill] sm:$0xff] %v3436_v0  ;;  %v1266_v19 = vmul.f32 %v3436_v0, %v3436_v0  ;;  %v1267_v32 = vmul.f32 %v3438_v8, %v3438_v8  ;;  %v1188_v1 = vadd.f32 %v3436_v0, %v3432_v61  ;;  %v1225_v6 = vadd.f32 %v3438_v8, %v3434_v5 }
 0x2b0   :  { %4542 = vst [vmem:[#allocation20_spill] sm:$0xff] %v3438_v8 }
 0x2b1   :  { %v1328_v14 = vadd.f32 %v1266_v19, %v1264_v57  ;;  %v1365_v16 = vadd.f32 %v1267_v32, %v1265_v59 }
 0x2b3   :  { %1063 = vmatmul.bf16.gmra.mxu2 %v907_v12  ;;  %1152 = vmatmul.bf16.gmra.mxu3 %v907_v12 }
 0x2b6   :  { %v3440_v33 = vpop.f32.mrf.mxu2  ;;  %v3442_v21 = vpop.f32.mrf.mxu3 }
 0x2b7   :  { %4543 = vst [vmem:[#allocation21_spill] sm:$0xff] %v3440_v33  ;;  %v1268_v58 = vmul.f32 %v3440_v33, %v3440_v33  ;;  %v1269_v60 = vmul.f32 %v3442_v21, %v3442_v21  ;;  %v1189_v48 = vadd.f32 %v1188_v1, %v3440_v33 }
 0x2b8   :  { %4544 = vst [vmem:[#allocation22_spill] sm:$0xff] %v3442_v21 }
 0x2be   :  { %v3444_v25 = vpop.f32.mrf.mxu2  ;;  %v3446_v47 = vpop.f32.mrf.mxu3 }
 0x2bf   :  { %4545 = vst [vmem:[#allocation23_spill] sm:$0xff] %v3444_v25  ;;  %v1270_v42 = vmul.f32 %v3444_v25, %v3444_v25 }
 0x2c0   :  { %4546 = vst [vmem:[#allocation24_spill] sm:$0xff] %v3446_v47 }
 0x2c3   :  { %1068 = vmatmul.bf16.gmra.mxu2 %v908_v52  ;;  %1157 = vmatmul.bf16.gmra.mxu3 %v908_v52 }
 0x2c6   :  { %v3448_v49 = vpop.f32.mrf.mxu2  ;;  %v3450_v50 = vpop.f32.mrf.mxu3 }
 0x2c7   :  { %4547 = vst [vmem:[#allocation25_spill] sm:$0xff] %v3448_v49  ;;  %v1272_v0 = vmul.f32 %v3448_v49, %v3448_v49  ;;  %v1273_v53 = vmul.f32 %v3450_v50, %v3450_v50 }
 0x2c8   :  { %4548 = vst [vmem:[#allocation26_spill] sm:$0xff] %v3450_v50 }
 0x2ce   :  { %v3452_v41 = vpop.f32.mrf.mxu2  ;;  %v3454_v62 = vpop.f32.mrf.mxu3 }
 0x2cf   :  { %4549 = vst [vmem:[#allocation27_spill] sm:$0xff] %v3452_v41 }
 0x2d0   :  { %4550 = vst [vmem:[#allocation28_spill] sm:$0xff] %v3454_v62 }
 0x2d3   :  { %1073 = vmatmul.bf16.gmra.mxu2 %v3400_v7  ;;  %1162 = vmatmul.bf16.gmra.mxu3 %v3400_v7 }
 0x2d6   :  { %v3458_v22 = vpop.f32.mrf.mxu2  ;;  %v3460_v2 = vpop.f32.mrf.mxu3 }
 0x2d7   :  { %4551 = vst [vmem:[#allocation29_spill] sm:$0xff] %v3458_v22  ;;  %v1276_v33 = vmul.f32 %v3458_v22, %v3458_v22 }
 0x2d8   :  { %4552 = vst [vmem:[#allocation30_spill] sm:$0xff] %v3460_v2 }
 0x2de   :  { %v3462_v9 = vpop.f32.mrf.mxu2  ;;  %v3464_v4 = vpop.f32.mrf.mxu3 }
 0x2df   :  { %4553 = vst [vmem:[#allocation31_spill] sm:$0xff] %v3462_v9 }
 0x2e0   :  { %4554 = vst [vmem:[#allocation32_spill] sm:$0xff] %v3464_v4 }
 0x2e3   :  { %1078 = vmatmul.bf16.gmra.mxu2 %v3406_v20  ;;  %1167 = vmatmul.bf16.gmra.mxu3 %v3406_v20 }
 0x2e6   :  { %v3468_v31 = vpop.f32.mrf.mxu2  ;;  %v3470_v10 = vpop.f32.mrf.mxu3 }
 0x2ee   :  { %v3472_v11 = vpop.f32.mrf.mxu2  ;;  %v3474_v23 = vpop.f32.mrf.mxu3 }
 0x2f3   :  { %1083 = vmatmul.bf16.gmra.mxu2 %v3409_v40  ;;  %1172 = vmatmul.bf16.gmra.mxu3 %v3409_v40  ;;  %v2587_v40 = vld [vmem:[#allocation10 + $0x78] sm:$0xff] }
 0x2f4   :  { %1965 = vmatpush.bf16.msrb.mxu1 %v2587_v40  ;;  %v1271_v40 = vmul.f32 %v3446_v47, %v3446_v47 }
 0x2f6   :  { %v3478_v63 = vpop.f32.mrf.mxu2  ;;  %v3480_v39 = vpop.f32.mrf.mxu3 }
 0x2f8   :  { %1966 = vmatpush.bf16.msrb.mxu1 %v2586_v46  ;;  %v1226_v46 = vadd.f32 %v1225_v6, %v3442_v21 }
 0x2fa   :  { %v1227_v57 = vadd.f32 %v1226_v46, %v3446_v47  ;;  %v1278_v46 = vmul.f32 %v3462_v9, %v3462_v9 }
 0x2fc   :  { %1967 = vmatpush.bf16.msrb.mxu1 %v2585_v55  ;;  %v1190_v55 = vadd.f32 %v1189_v48, %v3444_v25  ;;  %v1277_v48 = vmul.f32 %v3460_v2, %v3460_v2 }
 0x2fe   :  { %v3482_v37 = vpop.f32.mrf.mxu2  ;;  %v3484_v18 = vpop.f32.mrf.mxu3  ;;  %v1191_v6 = vadd.f32 %v1190_v55, %v3448_v49  ;;  %v1279_v55 = vmul.f32 %v3464_v4, %v3464_v4 }
 0x303   :  { %1088 = vmatmul.bf16.gmra.mxu2 %v3412_v44  ;;  %1177 = vmatmul.bf16.gmra.mxu3 %v3412_v44 }
 0x306   :  { %v3488_v27 = vpop.f32.mrf.mxu2  ;;  %v3490_v12 = vpop.f32.mrf.mxu3 }
 0x30e   :  { %v3492_v26 = vpop.f32.mrf.mxu2  ;;  %v3494_v51 = vpop.f32.mrf.mxu3 }
 0x313   :  { %1093 = vmatmul.bf16.gmra.mxu2 %v3414_v34  ;;  %1182 = vmatmul.bf16.gmra.mxu3 %v3414_v34 }
 0x316   :  { %v3498_v29 = vpop.f32.mrf.mxu2  ;;  %v3500_v52 = vpop.f32.mrf.mxu3 }
 0x31e   :  { %v3502_v28 = vpop.f32.mrf.mxu2  ;;  %v3504_v54 = vpop.f32.mrf.mxu3 }
 0x326   :  { %v3506_v35 = vpop.f32.mrf.mxu2  ;;  %v3508_v7 = vpop.f32.mrf.mxu3 }
 0x32e   :  { %v3510_v30 = vpop.f32.mrf.mxu2  ;;  %v3512_v38 = vpop.f32.mrf.mxu3 }
 0x336   :  { %v3514_v56 = vpop.f32.mrf.mxu2  ;;  %v3516_v36 = vpop.f32.mrf.mxu3 }
 0x33e   :  { %v3518_v15 = vpop.f32.mrf.mxu2  ;;  %v3520_v20 = vpop.f32.mrf.mxu3 }
 0x346   :  { %v3522_v24 = vpop.f32.mrf.mxu2  ;;  %v3524_v44 = vpop.f32.mrf.mxu3 }
 0x34e   :  { %v3526_v34 = vpop.f32.mrf.mxu2  ;;  %v3528_v43 = vpop.f32.mrf.mxu3 }
 0x356   :  { %v3530_v3 = vpop.f32.mrf.mxu2  ;;  %v3532_v45 = vpop.f32.mrf.mxu3 }
 0x357   :  { %4555 = vst [vmem:[#allocation33_spill] sm:$0xff] %v3532_v45  ;;  %v1308_v49 = vmul.f32 %v3530_v3, %v3530_v3 }
 0x35e   :  { %v3534_v17 = vpop.f32.mrf.mxu2  ;;  %v3536_v13 = vpop.f32.mrf.mxu3 }
 0x35f   :  { %4556 = vst [vmem:[#allocation34_spill] sm:$0xff] %v3534_v17  ;;  %v1366_v17 = vadd.f32 %v1365_v16, %v1269_v60  ;;  %v1275_v60 = vmul.f32 %v3454_v62, %v3454_v62 }
 0x360   :  { %4557 = vst [vmem:[#allocation35_spill] sm:$0xff] %v3536_v13  ;;  %v1329_v13 = vadd.f32 %v1328_v14, %v1268_v58  ;;  %v1274_v58 = vmul.f32 %v3452_v41, %v3452_v41  ;;  %v1228_v14 = vadd.f32 %v1227_v57, %v3450_v50 }
 0x361   :  { %v1367_v1 = vadd.f32 %v1366_v17, %v1271_v40  ;;  %v1192_v17 = vadd.f32 %v1191_v6, %v3452_v41  ;;  %v1281_v6 = vmul.f32 %v3470_v10, %v3470_v10  ;;  %v1300_v41 = vmul.f32 %v3514_v56, %v3514_v56 }
 0x362   :  { %v1330_v59 = vadd.f32 %v1329_v13, %v1270_v42  ;;  %v1229_v13 = vadd.f32 %v1228_v14, %v3454_v62 }
 0x363   :  { %v1368_v21 = vadd.f32 %v1367_v1, %v1273_v53  ;;  %v1280_v1 = vmul.f32 %v3468_v31, %v3468_v31 }
 0x364   :  { %v1331_v16 = vadd.f32 %v1330_v59, %v1272_v0  ;;  %v1193_v0 = vadd.f32 %v1192_v17, %v3458_v22  ;;  %v1230_v53 = vadd.f32 %v1229_v13, %v3460_v2  ;;  %v2584_v2 = vld [vmem:[#allocation10 + $0x60] sm:$0xff] }
 0x365   :  { %v1369_v40 = vadd.f32 %v1368_v21, %v1275_v60  ;;  %1968 = vmatpush.bf16.msrb.mxu1 %v2584_v2  ;;  %v1289_v2 = vmul.f32 %v3490_v12, %v3490_v12 }
 0x366   :  { %v3564_v19 = vpop.f32.mrf.mxu2  ;;  %v3566_v32 = vpop.f32.mrf.mxu3  ;;  %v1332_v42 = vadd.f32 %v1331_v16, %v1274_v58  ;;  %v1194_v60 = vadd.f32 %v1193_v0, %v3462_v9  ;;  %v1231_v14 = vadd.f32 %v1230_v53, %v3464_v4  ;;  %v1284_v0 = vmul.f32 %v3478_v63, %v3478_v63 }
 0x367   :  { %v1370_v59 = vadd.f32 %v1369_v40, %v1277_v48  ;;  %v1283_v48 = vmul.f32 %v3474_v23, %v3474_v23  ;;  %v2576_v40 = vld [vmem:[#allocation10 + $0x20] sm:$0xff]  ;;  %v1292_v4 = vmul.f32 %v3498_v29, %v3498_v29  ;;  %v1312_v25 = vmul.f32 %v3564_v19, %v3564_v19 }
 0x368   :  { %v1333_v57 = vadd.f32 %v1332_v42, %v1276_v33  ;;  %v1282_v33 = vmul.f32 %v3472_v11, %v3472_v11  ;;  %v1195_v13 = vadd.f32 %v1194_v60, %v3468_v31  ;;  %v1232_v42 = vadd.f32 %v1231_v14, %v3470_v10  ;;  %1879 = vmatpush.bf16.msrb.mxu0 %v2576_v40 }
 0x369   :  { %v1371_v17 = vadd.f32 %v1370_v59, %v1279_v55  ;;  %v1286_v60 = vmul.f32 %v3482_v37, %v3482_v37 }
 0x36a   :  { %v1334_v16 = vadd.f32 %v1333_v57, %v1278_v46  ;;  %v1285_v46 = vmul.f32 %v3480_v39, %v3480_v39  ;;  %v1196_v55 = vadd.f32 %v1195_v13, %v3472_v11  ;;  %v1233_v53 = vadd.f32 %v1232_v42, %v3474_v23 }
 0x36b   :  { %v1372_v62 = vadd.f32 %v1371_v17, %v1281_v6  ;;  %v1288_v13 = vmul.f32 %v3488_v27, %v3488_v27 }
 0x36c   :  { %v1335_v22 = vadd.f32 %v1334_v16, %v1280_v1  ;;  %v1287_v1 = vmul.f32 %v3484_v18, %v3484_v18  ;;  %v1197_v6 = vadd.f32 %v1196_v55, %v3478_v63  ;;  %v1234_v14 = vadd.f32 %v1233_v53, %v3480_v39 }
 0x36d   :  { %v1373_v59 = vadd.f32 %v1372_v62, %v1283_v48 }
 0x36e   :  { %v3592_v58 = vpop.f32.mrf.mxu2  ;;  %v3594_v21 = vpop.f32.mrf.mxu3  ;;  %v1336_v57 = vadd.f32 %v1335_v22, %v1282_v33  ;;  %v1198_v33 = vadd.f32 %v1197_v6, %v3482_v37  ;;  %v1235_v48 = vadd.f32 %v1234_v14, %v3484_v18  ;;  %v1293_v6 = vmul.f32 %v3500_v52, %v3500_v52 }
 0x36f   :  { %4558 = vst [vmem:[#allocation36_spill] sm:$0xff] %v3594_v21  ;;  %v1374_v17 = vadd.f32 %v1373_v59, %v1285_v46  ;;  %v1291_v46 = vmul.f32 %v3494_v51, %v3494_v51 }
 0x370   :  { %v1337_v16 = vadd.f32 %v1336_v57, %v1284_v0  ;;  %v1290_v0 = vmul.f32 %v3492_v26, %v3492_v26  ;;  %v1199_v55 = vadd.f32 %v1198_v33, %v3488_v27  ;;  %v1236_v53 = vadd.f32 %v1235_v48, %v3490_v12 }
 0x371   :  { %v1375_v40 = vadd.f32 %v1374_v17, %v1287_v1  ;;  %v1294_v17 = vmul.f32 %v3502_v28, %v3502_v28  ;;  %v1295_v33 = vmul.f32 %v3504_v54, %v3504_v54 }
 0x372   :  { %v1338_v42 = vadd.f32 %v1337_v16, %v1286_v60  ;;  %v1200_v60 = vadd.f32 %v1199_v55, %v3492_v26  ;;  %v1237_v1 = vadd.f32 %v1236_v53, %v3494_v51  ;;  %v1297_v55 = vmul.f32 %v3508_v7, %v3508_v7 }
 0x373   :  { %v1376_v59 = vadd.f32 %v1375_v40, %v1289_v2  ;;  %v1296_v40 = vmul.f32 %v3506_v35, %v3506_v35 }
 0x374   :  { %v1339_v57 = vadd.f32 %v1338_v42, %v1288_v13  ;;  %v1201_v13 = vadd.f32 %v1200_v60, %v3498_v29  ;;  %v1238_v2 = vadd.f32 %v1237_v1, %v3500_v52 }
 0x375   :  { %v1377_v16 = vadd.f32 %v1376_v59, %v1291_v46 }
 0x376   :  { %v3620_v22 = vpop.f32.mrf.mxu2  ;;  %v3622_v62 = vpop.f32.mrf.mxu3  ;;  %v1340_v14 = vadd.f32 %v1339_v57, %v1290_v0  ;;  %v1202_v53 = vadd.f32 %v1201_v13, %v3502_v28  ;;  %v1239_v57 = vadd.f32 %v1238_v2, %v3504_v54  ;;  %v1301_v13 = vmul.f32 %v3516_v36, %v3516_v36 }
 0x377   :  { %4559 = vst [vmem:[#allocation37_spill] sm:$0xff] %v3620_v22  ;;  %v1378_v42 = vadd.f32 %v1377_v16, %v1293_v6  ;;  %v1299_v6 = vmul.f32 %v3512_v38, %v3512_v38 }
 0x378   :  { %4560 = vst [vmem:[#allocation38_spill] sm:$0xff] %v3622_v62  ;;  %v1341_v48 = vadd.f32 %v1340_v14, %v1292_v4  ;;  %v1298_v4 = vmul.f32 %v3510_v30, %v3510_v30  ;;  %v1203_v1 = vadd.f32 %v1202_v53, %v3506_v35  ;;  %v1240_v14 = vadd.f32 %v1239_v57, %v3508_v7 }
 0x379   :  { %v1379_v60 = vadd.f32 %v1378_v42, %v1295_v33  ;;  %v1302_v42 = vmul.f32 %v3518_v15, %v3518_v15  ;;  %v1303_v53 = vmul.f32 %v3520_v20, %v3520_v20 }
 0x37a   :  { %v1342_v59 = vadd.f32 %v1341_v48, %v1294_v17  ;;  %v1204_v17 = vadd.f32 %v1203_v1, %v3510_v30  ;;  %v1241_v33 = vadd.f32 %v1240_v14, %v3512_v38  ;;  %v1305_v1 = vmul.f32 %v3524_v44, %v3524_v44 }
 0x37b   :  { %v1380_v9 = vadd.f32 %v1379_v60, %v1297_v55  ;;  %v1304_v60 = vmul.f32 %v3522_v24, %v3522_v24 }
 0x37c   :  { %v1343_v16 = vadd.f32 %v1342_v59, %v1296_v40  ;;  %v1205_v40 = vadd.f32 %v1204_v17, %v3514_v56  ;;  %v1242_v55 = vadd.f32 %v1241_v33, %v3516_v36 }
 0x37d   :  { %v1381_v48 = vadd.f32 %v1380_v9, %v1299_v6 }
 0x37e   :  { %v3648_v0 = vpop.f32.mrf.mxu2  ;;  %v3650_v46 = vpop.f32.mrf.mxu3  ;;  %v1344_v2 = vadd.f32 %v1343_v16, %v1298_v4  ;;  %v1206_v6 = vadd.f32 %v1205_v40, %v3518_v15  ;;  %v1243_v14 = vadd.f32 %v1242_v55, %v3520_v20  ;;  %v1309_v40 = vmul.f32 %v3532_v45, %v3532_v45 }
 0x37f   :  { %4561 = vst [vmem:[#allocation39_spill] sm:$0xff] %v3648_v0  ;;  %v1382_v59 = vadd.f32 %v1381_v48, %v1301_v13  ;;  %v1307_v13 = vmul.f32 %v3528_v43, %v3528_v43 }
 0x380   :  { %4562 = vst [vmem:[#allocation40_spill] sm:$0xff] %v3650_v46  ;;  %v1345_v57 = vadd.f32 %v1344_v2, %v1300_v41  ;;  %v1306_v41 = vmul.f32 %v3526_v34, %v3526_v34  ;;  %v1207_v33 = vadd.f32 %v1206_v6, %v3522_v24  ;;  %v1244_v2 = vadd.f32 %v1243_v14, %v3524_v44  ;;  %v4566_v6 = vld [vmem:[#allocation35_spill] sm:$0xff] }
 0x381   :  { %v1383_v17 = vadd.f32 %v1382_v59, %v1303_v53  ;;  %v4565_v59 = vld [vmem:[#allocation34_spill] sm:$0xff]  ;;  %v1311_v14 = vmul.f32 %v4566_v6, %v4566_v6 }
 0x382   :  { %v1346_v16 = vadd.f32 %v1345_v57, %v1302_v42  ;;  %v1208_v42 = vadd.f32 %v1207_v33, %v3526_v34  ;;  %v1245_v53 = vadd.f32 %v1244_v2, %v3528_v43  ;;  %v1310_v47 = vmul.f32 %v4565_v59, %v4565_v59 }
 0x383   :  { %v1384_v50 = vadd.f32 %v1383_v17, %v1305_v1  ;;  %v1313_v33 = vmul.f32 %v3566_v32, %v3566_v32 }
 0x384   :  { %v1347_v48 = vadd.f32 %v1346_v16, %v1304_v60  ;;  %v1209_v60 = vadd.f32 %v1208_v42, %v3530_v3  ;;  %v1246_v1 = vadd.f32 %v1245_v53, %v3532_v45  ;;  %v1316_v45 = vmul.f32 %v3620_v22, %v3620_v22 }
 0x385   :  { %v1385_v57 = vadd.f32 %v1384_v50, %v1307_v13 }
 0x386   :  { %v3676_v4 = vpop.f32.mrf.mxu2  ;;  %v3678_v9 = vpop.f32.mrf.mxu3  ;;  %v1348_v55 = vadd.f32 %v1347_v48, %v1306_v41  ;;  %v1210_v13 = vadd.f32 %v1209_v60, %v4565_v59  ;;  %v1247_v2 = vadd.f32 %v1246_v1, %v4566_v6  ;;  %v1317_v60 = vmul.f32 %v3622_v62, %v3622_v62 }
 0x387   :  { %4563 = vst [vmem:[#allocation41_spill] sm:$0xff] %v3676_v4  ;;  %v1386_v17 = vadd.f32 %v1385_v57, %v1309_v40  ;;  %v1315_v40 = vmul.f32 %v3594_v21, %v3594_v21 }
 0x388   :  { %4564 = vst [vmem:[#allocation42_spill] sm:$0xff] %v3678_v9  ;;  %v1349_v16 = vadd.f32 %v1348_v55, %v1308_v49  ;;  %v1314_v49 = vmul.f32 %v3592_v58, %v3592_v58  ;;  %v1211_v53 = vadd.f32 %v1210_v13, %v3564_v19  ;;  %v1248_v55 = vadd.f32 %v1247_v2, %v3566_v32 }
 0x389   :  { %v1387_v42 = vadd.f32 %v1386_v17, %v1311_v14  ;;  %v1318_v17 = vmul.f32 %v3648_v0, %v3648_v0  ;;  %v1319_v13 = vmul.f32 %v3650_v46, %v3650_v46 }
 0x38a   :  { %v1350_v48 = vadd.f32 %v1349_v16, %v1310_v47  ;;  %v1212_v47 = vadd.f32 %v1211_v53, %v3592_v58  ;;  %v1249_v14 = vadd.f32 %v1248_v55, %v3594_v21  ;;  %v1321_v53 = vmul.f32 %v3678_v9, %v3678_v9 }
 0x38b   :  { %v1388_v8 = vadd.f32 %v1387_v42, %v1313_v33  ;;  %v1320_v42 = vmul.f32 %v3676_v4, %v3676_v4 }
 0x38c   :  { %v1351_v57 = vadd.f32 %v1350_v48, %v1312_v25  ;;  %v1213_v25 = vadd.f32 %v1212_v47, %v3620_v22  ;;  %v1250_v33 = vadd.f32 %v1249_v14, %v3622_v62 }
 0x38d   :  { %v1389_v16 = vadd.f32 %v1388_v8, %v1315_v40 }
 0x38e   :  { %v3704_v41 = vpop.f32.mrf.mxu2  ;;  %v3706_v50 = vpop.f32.mrf.mxu3  ;;  %v1352_v1 = vadd.f32 %v1351_v57, %v1314_v49  ;;  %v1214_v40 = vadd.f32 %v1213_v25, %v3648_v0  ;;  %v1251_v55 = vadd.f32 %v1250_v33, %v3650_v46 }
 0x38f   :  { %4567 = vst [vmem:[#allocation34_spill] sm:$0xff] %v3704_v41  ;;  %v1390_v48 = vadd.f32 %v1389_v16, %v1317_v60  ;;  %v1323_v60 = vmul.f32 %v3706_v50, %v3706_v50 }
 0x390   :  { %4568 = vst [vmem:[#allocation35_spill] sm:$0xff] %v3706_v50  ;;  %v1353_v2 = vadd.f32 %v1352_v1, %v1316_v45  ;;  %v1322_v45 = vmul.f32 %v3704_v41, %v3704_v41  ;;  %v1215_v14 = vadd.f32 %v1214_v40, %v3676_v4  ;;  %v1252_v1 = vadd.f32 %v1251_v55, %v3678_v9 }
 0x391   :  { %v1391_v47 = vadd.f32 %v1390_v48, %v1319_v13 }
 0x392   :  { %v1354_v57 = vadd.f32 %v1353_v2, %v1318_v17  ;;  %v1216_v17 = vadd.f32 %v1215_v14, %v3704_v41  ;;  %v1253_v13 = vadd.f32 %v1252_v1, %v3706_v50 }
 0x393   :  { %v1392_v62 = vadd.f32 %v1391_v47, %v1321_v53 }
 0x394   :  { %v1355_v16 = vadd.f32 %v1354_v57, %v1320_v42 }
 0x395   :  { %v1393_v2 = vadd.f32 %v1392_v62, %v1323_v60 }
 0x396   :  { %v3732_v49 = vpop.f32.mrf.mxu2  ;;  %v3734_v8 = vpop.f32.mrf.mxu3  ;;  %v1356_v33 = vadd.f32 %v1355_v16, %v1322_v45 }
 0x397   :  { %4569 = vst [vmem:[#allocation43_spill] sm:$0xff] %v3732_v49  ;;  %v1324_v22 = vmul.f32 %v3732_v49, %v3732_v49  ;;  %v1325_v25 = vmul.f32 %v3734_v8, %v3734_v8  ;;  %v1217_v48 = vadd.f32 %v1216_v17, %v3732_v49  ;;  %v1254_v40 = vadd.f32 %v1253_v13, %v3734_v8 }
 0x398   :  { %4570 = vst [vmem:[#allocation44_spill] sm:$0xff] %v3734_v8 }
 0x399   :  { %v1357_v4 = vadd.f32 %v1356_v33, %v1324_v22  ;;  %v1394_v55 = vadd.f32 %v1393_v2, %v1325_v25 }
 0x39e   :  { %v3752_v42 = vpop.f32.mrf.mxu2  ;;  %v3754_v53 = vpop.f32.mrf.mxu3 }
 0x39f   :  { %4571 = vst [vmem:[#allocation45_spill] sm:$0xff] %v3752_v42  ;;  %v1218_v57 = vadd.f32 %v1217_v48, %v3752_v42  ;;  %v1326_v47 = vmul.f32 %v3752_v42, %v3752_v42  ;;  %v1255_v14 = vadd.f32 %v1254_v40, %v3754_v53  ;;  %v1327_v62 = vmul.f32 %v3754_v53, %v3754_v53 }
 0x3a1   :  { %v1219_v45 = vrot.slane %v1218_v57, 4  ;;  %v1358_v60 = vadd.f32 %v1357_v4, %v1326_v47  ;;  %v1256_v1 = vrot.slane %v1255_v14, 4  ;;  %v1395_v16 = vadd.f32 %v1394_v55, %v1327_v62 }
 0x3a3   :  { %v1220_v22 = vadd.f32 %v1219_v45, %v1218_v57  ;;  %v1359_v25 = vrot.slane %v1358_v60, 4  ;;  %v1257_v17 = vadd.f32 %v1256_v1, %v1255_v14  ;;  %v1396_v13 = vrot.slane %v1395_v16, 4 }
 0x3a5   :  { %v1221_v33 = vrot.slane %v1220_v22, 2  ;;  %v1360_v2 = vadd.f32 %v1359_v25, %v1358_v60  ;;  %v1258_v8 = vrot.slane %v1257_v17, 2  ;;  %v1397_v48 = vadd.f32 %v1396_v13, %v1395_v16 }
 0x3a7   :  { %v1222_v49 = vadd.f32 %v1221_v33, %v1220_v22  ;;  %v1361_v50 = vrot.slane %v1360_v2, 2  ;;  %v1259_v42 = vadd.f32 %v1258_v8, %v1257_v17  ;;  %v1398_v41 = vrot.slane %v1397_v48, 2 }
 0x3a9   :  { %v1223_v40 = vrot.slane %v1222_v49, 1  ;;  %v1362_v9 = vadd.f32 %v1361_v50, %v1360_v2  ;;  %v1260_v46 = vrot.slane %v1259_v42, 1  ;;  %v1399_v0 = vadd.f32 %v1398_v41, %v1397_v48 }
 0x3ab   :  { %v1224_v21 = vadd.f32 %v1223_v40, %v1222_v49  ;;  %v1363_v4 = vrot.slane %v1362_v9, 1  ;;  %v1261_v47 = vadd.f32 %v1260_v46, %v1259_v42  ;;  %v1400_v55 = vrot.slane %v1399_v0, 1 }
 0x3ad   :  { %v1262_v57 = vmul.f32 0.00390625, %v1224_v21  ;;  %v1364_v62 = vadd.f32 %v1363_v4, %v1362_v9  ;;  %v1263_v14 = vmul.f32 0.00390625, %v1261_v47  ;;  %v1401_v45 = vadd.f32 %v1400_v55, %v1399_v0 }
 0x3af   :  { %v1402_v1 = vmul.f32 0.00390625, %v1364_v62  ;;  %v1404_v60 = vmul.f32 %v1262_v57, %v1262_v57  ;;  %v1403_v25 = vmul.f32 0.00390625, %v1401_v45  ;;  %v1405_v16 = vmul.f32 %v1263_v14, %v1263_v14  ;;  %v119_v62 = vld [vmem:[#allocation11 + $0x3] sm:$0x3] }
 0x3b1   :  { %v1406_v22 = vsub.f32 %v1402_v1, %v1404_v60  ;;  %v1407_v13 = vsub.f32 %v1403_v25, %v1405_v16 }
 0x3b3   :  { %v1408_v8 = vmax.f32 %v1406_v22, 0.0  ;;  %v1409_v17 = vmax.f32 %v1407_v13, 0.0 }
 0x3b5   :  { %v1410_v33 = vadd.f32 1e-05, %v1408_v8  ;;  %v1411_v50 = vadd.f32 1e-05, %v1409_v17  ;;  %v120_v17 = vld [vmem:[#allocation11 + $0x5] sm:$0x3] }
 0x3b7   :  { %2714 = vrsqrt.f32 %v1410_v33  ;;  %vm1428_vm5 = vweird.f32 %v1411_v50  ;;  %vm1418_vm7 = vweird.f32 %v1410_v33 }
 0x3b8   :  { %2716 = vrsqrt.f32 %v1411_v50 }
 0x3bd   :  { %v2715_v41 = vpop.eup %2714 }
 0x3be   :  { %v2717_v49 = vpop.eup %2716  ;;  %v1413_v46 = vmul.f32 %v2715_v41, %v1410_v33  ;;  %vm1419_vm4 = vweird.f32 %v2715_v41 }
 0x3bf   :  { %v1423_v42 = vmul.f32 %v2717_v49, %v1411_v50  ;;  %vm1429_vm3 = vweird.f32 %v2717_v49  ;;  %vm1420_vm9 = vmor %vm1418_vm7, %vm1419_vm4 }
 0x3c0   :  { %v1414_v21 = vmul.f32 %v2715_v41, %v1413_v46  ;;  %vm1430_vm6 = vmor %vm1428_vm5, %vm1429_vm3  ;;  %v2575_v46 = vld [vmem:[#allocation10 + $0x18] sm:$0xff] }
 0x3c1   :  { %v1424_v9 = vmul.f32 %v2717_v49, %v1423_v42  ;;  %v2583_v42 = vld [vmem:[#allocation10 + $0x58] sm:$0xff]  ;;  %1880 = vmatpush.bf16.msrb.mxu0 %v2575_v46  ;;  %v4584_v46 = vld [vmem:[#allocation42_spill] sm:$0xff] }
 0x3c2   :  { %v1415_v2 = vmul.f32 0.5, %v1414_v21  ;;  %1969 = vmatpush.bf16.msrb.mxu1 %v2583_v42 }
 0x3c3   :  { %v1425_v0 = vmul.f32 0.5, %v1424_v9 }
 0x3c4   :  { %v1416_v48 = vsub.f32 1.5, %v1415_v2 }
 0x3c5   :  { %v1426_v40 = vsub.f32 1.5, %v1425_v0 }
 0x3c6   :  { %v1417_v4 = vmul.f32 %v2715_v41, %v1416_v48 }
 0x3c7   :  { %v1427_v47 = vmul.f32 %v2717_v49, %v1426_v40  ;;  %v2574_v40 = vld [vmem:[#allocation10 + $0x10] sm:$0xff] }
 0x3c8   :  { %v1421_v1 = vsel %vm1420_vm9, %v2715_v41, %v1417_v4  ;;  %1881 = vmatpush.bf16.msrb.mxu0 %v2574_v40 }
 0x3c9   :  { %v1431_v55 = vsel %vm1430_vm6, %v2717_v49, %v1427_v47 }
 0x3ca   :  { %v1434_v45 = vrot.slane %v1431_v55, 7 }
 0x3cc   :  { %v1436_v60 = vsel %vm1435_vm8, %v1421_v1, %v1434_v45 }
 0x3cd   :  { %v1438_v25 = vmul.f32 %v1436_v60, %v119_v62  ;;  %v2581_v62 = vld [vmem:[#allocation10 + $0x48] sm:$0xff] }
 0x3cf   :  { %v3762_v16 = vperm.slane %v1438_v25, 0  ;;  %v3764_v22 = vperm.slane %v1438_v25, 1  ;;  %v4579_v25 = vld [vmem:[#allocation37_spill] sm:$0xff] }
 0x3d1   :  { %4572 = vst [vmem:[#allocation46_spill] sm:$0xff] %v3762_v16  ;;  %v1445_v13 = vmul.f32 %v3764_v22, %v1263_v14  ;;  %v1515_v8 = vmul.f32 %v3764_v22, %v3754_v53  ;;  %v1444_v33 = vmul.f32 %v3762_v16, %v1262_v57  ;;  %v3772_v41 = vmul.f32 %v3762_v16, %v3432_v61 }
 0x3d2   :  { %4573 = vst [vmem:[#allocation47_spill] sm:$0xff] %v3764_v22  ;;  %v3776_v9 = vmul.f32 %v3764_v22, %v3434_v5  ;;  %v1468_v53 = vmul.f32 %v3762_v16, %v3468_v31  ;;  %v1469_v57 = vmul.f32 %v3764_v22, %v3470_v10  ;;  %v1470_v2 = vmul.f32 %v3762_v16, %v3472_v11  ;;  %v2582_v31 = vld [vmem:[#allocation10 + $0x50] sm:$0xff] }
 0x3d3   :  { %v1448_v50 = vrot.slane %v1445_v13, 7  ;;  %v1471_v61 = vmul.f32 %v3764_v22, %v3474_v23  ;;  %v1472_v5 = vmul.f32 %v3762_v16, %v3478_v63  ;;  %v1473_v48 = vmul.f32 %v3764_v22, %v3480_v39  ;;  %1970 = vmatpush.bf16.msrb.mxu1 %v2582_v31  ;;  %v4586_v31 = vld [vmem:[#allocation35_spill] sm:$0xff] }
 0x3d4   :  { %v1474_v10 = vmul.f32 %v3762_v16, %v3482_v37  ;;  %v1475_v11 = vmul.f32 %v3764_v22, %v3484_v18  ;;  %v1476_v23 = vmul.f32 %v3762_v16, %v3488_v27  ;;  %v1477_v63 = vmul.f32 %v3764_v22, %v3490_v12 }
 0x3d5   :  { %v1449_v49 = vsel %vm1435_vm8, %v1444_v33, %v1448_v50  ;;  %v1478_v39 = vmul.f32 %v3762_v16, %v3492_v26  ;;  %v1479_v47 = vmul.f32 %v3764_v22, %v3494_v51  ;;  %v1480_v55 = vmul.f32 %v3762_v16, %v3498_v29  ;;  %v4581_v33 = vld [vmem:[#allocation39_spill] sm:$0xff]  ;;  %v4582_v50 = vld [vmem:[#allocation40_spill] sm:$0xff] }
 0x3d6   :  { %v1451_v21 = vsub.f32 %v120_v17, %v1449_v49  ;;  %v1481_v37 = vmul.f32 %v3764_v22, %v3500_v52  ;;  %v1482_v18 = vmul.f32 %v3762_v16, %v3502_v28  ;;  %v1483_v27 = vmul.f32 %v3764_v22, %v3504_v54  ;;  %v2573_v28 = vld [vmem:[#allocation10 + $0x8] sm:$0xff]  ;;  %v4580_v17 = vld [vmem:[#allocation38_spill] sm:$0xff]  ;;  %v4583_v49 = vld [vmem:[#allocation41_spill] sm:$0xff] }
 0x3d7   :  { %v1484_v12 = vmul.f32 %v3762_v16, %v3506_v35  ;;  %v1485_v26 = vmul.f32 %v3764_v22, %v3508_v7  ;;  %v1486_v51 = vmul.f32 %v3762_v16, %v3510_v30  ;;  %v1487_v29 = vmul.f32 %v3764_v22, %v3512_v38  ;;  %1882 = vmatpush.bf16.msrb.mxu0 %v2573_v28 }
 0x3d8   :  { %v3778_v14 = vperm.slane %v1451_v21, 1  ;;  %v3786_v0 = vperm.slane %v1451_v21, 0  ;;  %v1488_v52 = vmul.f32 %v3762_v16, %v3514_v56  ;;  %v1489_v54 = vmul.f32 %v3764_v22, %v3516_v36  ;;  %1971 = vmatpush.bf16.msrb.mxu1 %v2581_v62  ;;  %v4585_v21 = vld [vmem:[#allocation34_spill] sm:$0xff]  ;;  %v4587_v62 = vld [vmem:[#allocation43_spill] sm:$0xff] }
 0x3d9   :  { %v1490_v35 = vmul.f32 %v3762_v16, %v3518_v15  ;;  %v1491_v7 = vmul.f32 %v3764_v22, %v3520_v20  ;;  %v1492_v30 = vmul.f32 %v3762_v16, %v3522_v24  ;;  %v1493_v38 = vmul.f32 %v3764_v22, %v3524_v44  ;;  %v4577_v15 = vld [vmem:[#allocation33_spill] sm:$0xff] }
 0x3da   :  { %4574 = vst [vmem:[#allocation48_spill] sm:$0xff] %v3778_v14  ;;  %v3795_v4 = vadd.f32 %v3778_v14, %v1515_v8  ;;  %v1494_v56 = vmul.f32 %v3762_v16, %v3526_v34  ;;  %v1495_v45 = vmul.f32 %v3764_v22, %v3528_v43  ;;  %v1496_v36 = vmul.f32 %v3762_v16, %v3530_v3  ;;  %v4578_v3 = vld [vmem:[#allocation36_spill] sm:$0xff]  ;;  %v2580_v8 = vld [vmem:[#allocation10 + $0x40] sm:$0xff] }
 0x3db   :  { %4575 = vst [vmem:[#allocation49_spill] sm:$0xff] %v3786_v0  ;;  %v1497_v1 = vmul.f32 %v3764_v22, %v4577_v15  ;;  %v1498_v20 = vmul.f32 %v3762_v16, %v4565_v59  ;;  %v1499_v24 = vmul.f32 %v3764_v22, %v4566_v6  ;;  %v1500_v44 = vmul.f32 %v3762_v16, %v3564_v19  ;;  %v2572_v59 = vld [vmem:[#allocation10] sm:$0xff] }
 0x3dc   :  { %4576 = vst [vmem:[#allocation50_spill] sm:$0xff] %v3795_v4  ;;  %v1501_v34 = vmul.f32 %v3764_v22, %v3566_v32  ;;  %v1502_v43 = vmul.f32 %v3762_v16, %v3592_v58  ;;  %v1503_v60 = vmul.f32 %v3764_v22, %v4578_v3  ;;  %v1504_v13 = vmul.f32 %v3762_v16, %v4579_v25  ;;  %v4588_v3 = vld [vmem:[#allocation44_spill] sm:$0xff] }
 0x3dd   :  { %v1505_v6 = vmul.f32 %v3764_v22, %v4580_v17  ;;  %v1506_v19 = vmul.f32 %v3762_v16, %v4581_v33  ;;  %v1507_v32 = vmul.f32 %v3764_v22, %v4582_v50  ;;  %v1508_v58 = vmul.f32 %v3762_v16, %v4583_v49  ;;  %1883 = vmatpush.bf16.msrb.mxu0 %v2572_v59  ;;  %v4589_v17 = vld [vmem:[#allocation45_spill] sm:$0xff] }
 0x3de   :  { %v1509_v42 = vmul.f32 %v3764_v22, %v4584_v46  ;;  %v1510_v40 = vmul.f32 %v3762_v16, %v4585_v21  ;;  %v1511_v28 = vmul.f32 %v3764_v22, %v4586_v31  ;;  %v1512_v15 = vmul.f32 %v3762_v16, %v4587_v62  ;;  %1972 = vmatpush.bf16.msrb.mxu1 %v2580_v8 }
 0x3df   :  { %v1513_v25 = vmul.f32 %v3764_v22, %v4588_v3  ;;  %v1514_v33 = vmul.f32 %v3762_v16, %v4589_v17  ;;  %v3880_v50 = vadd.f32 %v3786_v0, %v1468_v53  ;;  %v3883_v49 = vadd.f32 %v3778_v14, %v1469_v57 }
 0x3e0   :  { %v3886_v46 = vadd.f32 %v3786_v0, %v1470_v2  ;;  %v3889_v21 = vadd.f32 %v3778_v14, %v1471_v61  ;;  %v3892_v59 = vadd.f32 %v3786_v0, %v1472_v5  ;;  %v3895_v31 = vadd.f32 %v3778_v14, %v1473_v48 }
 0x3e1   :  { %4590 = vst [vmem:[#allocation33_spill] sm:$0xff] %v3883_v49  ;;  %v3898_v62 = vadd.f32 %v3786_v0, %v1474_v10  ;;  %v3901_v53 = vadd.f32 %v3778_v14, %v1475_v11  ;;  %v3904_v57 = vadd.f32 %v3786_v0, %v1476_v23  ;;  %v3907_v2 = vadd.f32 %v3778_v14, %v1477_v63 }
 0x3e2   :  { %4591 = vst [vmem:[#allocation36_spill] sm:$0xff] %v3889_v21  ;;  %v3910_v61 = vadd.f32 %v3786_v0, %v1478_v39  ;;  %v3913_v5 = vadd.f32 %v3778_v14, %v1479_v47  ;;  %v3916_v48 = vadd.f32 %v3786_v0, %v1480_v55  ;;  %v3919_v10 = vadd.f32 %v3778_v14, %v1481_v37 }
 0x3e3   :  { %4592 = vst [vmem:[#allocation37_spill] sm:$0xff] %v3895_v31  ;;  %v3922_v11 = vadd.f32 %v3786_v0, %v1482_v18  ;;  %v3925_v23 = vadd.f32 %v3778_v14, %v1483_v27  ;;  %v3928_v63 = vadd.f32 %v3786_v0, %v1484_v12  ;;  %v3931_v39 = vadd.f32 %v3778_v14, %v1485_v26 }
 0x3e4   :  { %4593 = vst [vmem:[#allocation38_spill] sm:$0xff] %v3904_v57  ;;  %v3934_v47 = vadd.f32 %v3786_v0, %v1486_v51  ;;  %v3937_v55 = vadd.f32 %v3778_v14, %v1487_v29  ;;  %v3940_v37 = vadd.f32 %v3786_v0, %v1488_v52  ;;  %v3943_v18 = vadd.f32 %v3778_v14, %v1489_v54 }
 0x3e5   :  { %4594 = vst [vmem:[#allocation39_spill] sm:$0xff] %v3907_v2  ;;  %v3946_v27 = vadd.f32 %v3786_v0, %v1490_v35  ;;  %v3949_v12 = vadd.f32 %v3778_v14, %v1491_v7  ;;  %v3952_v26 = vadd.f32 %v3786_v0, %v1492_v30  ;;  %v3955_v51 = vadd.f32 %v3778_v14, %v1493_v38 }
 0x3e6   :  { %4595 = vst [vmem:[#allocation40_spill] sm:$0xff] %v3913_v5  ;;  %v3958_v29 = vadd.f32 %v3786_v0, %v1494_v56  ;;  %v3961_v52 = vadd.f32 %v3778_v14, %v1495_v45  ;;  %v3964_v54 = vadd.f32 %v3786_v0, %v1496_v36  ;;  %v3967_v35 = vadd.f32 %v3778_v14, %v1497_v1 }
 0x3e7   :  { %4596 = vst [vmem:[#allocation41_spill] sm:$0xff] %v3916_v48  ;;  %v3970_v7 = vadd.f32 %v3786_v0, %v1498_v20  ;;  %v3973_v30 = vadd.f32 %v3778_v14, %v1499_v24  ;;  %v3976_v38 = vadd.f32 %v3786_v0, %v1500_v44  ;;  %v3979_v56 = vadd.f32 %v3778_v14, %v1501_v34 }
 0x3e8   :  { %4597 = vst [vmem:[#allocation42_spill] sm:$0xff] %v3919_v10  ;;  %v3982_v45 = vadd.f32 %v3786_v0, %v1502_v43  ;;  %v3985_v36 = vadd.f32 %v3778_v14, %v1503_v60  ;;  %v3988_v1 = vadd.f32 %v3786_v0, %v1504_v13  ;;  %v3991_v20 = vadd.f32 %v3778_v14, %v1505_v6 }
 0x3e9   :  { %4598 = vst [vmem:[#allocation34_spill] sm:$0xff] %v3925_v23  ;;  %v3994_v24 = vadd.f32 %v3786_v0, %v1506_v19  ;;  %v3997_v44 = vadd.f32 %v3778_v14, %v1507_v32  ;;  %v4000_v34 = vadd.f32 %v3786_v0, %v1508_v58  ;;  %v4003_v43 = vadd.f32 %v3778_v14, %v1509_v42  ;;  %v4625_v42 = vld [vmem:[#allocation19_spill] sm:$0xff] }
 0x3ea   :  { %4599 = vst [vmem:[#allocation35_spill] sm:$0xff] %v3928_v63  ;;  %v4006_v60 = vadd.f32 %v3786_v0, %v1510_v40  ;;  %v4009_v13 = vadd.f32 %v3778_v14, %v1511_v28  ;;  %v4012_v8 = vadd.f32 %v3786_v0, %v1512_v15  ;;  %v4015_v6 = vadd.f32 %v3778_v14, %v1513_v25  ;;  %v4627_v15 = vld [vmem:[#allocation20_spill] sm:$0xff]  ;;  %v4628_v25 = vld [vmem:[#allocation21_spill] sm:$0xff] }
 0x3eb   :  { %4600 = vst [vmem:[#allocation43_spill] sm:$0xff] %v3931_v39  ;;  %v4018_v19 = vadd.f32 %v3786_v0, %v1514_v33  ;;  %v4022_v32 = vadd.f32 %v3786_v0, %v3772_v41  ;;  %v4026_v58 = vadd.f32 %v3778_v14, %v3776_v9  ;;  %v1454_v40 = vmul.f32 %v3762_v16, %v4625_v42  ;;  %v4629_v33 = vld [vmem:[#allocation22_spill] sm:$0xff]  ;;  %v4631_v9 = vld [vmem:[#allocation24_spill] sm:$0xff] }
 0x3ec   :  { %4601 = vst [vmem:[#allocation44_spill] sm:$0xff] %v3940_v37  ;;  %v4031_v28 = vmul.f32 0.2, %v3795_v4  ;;  %v1455_v3 = vmul.f32 %v3764_v22, %v4627_v15  ;;  %v1456_v17 = vmul.f32 %v3762_v16, %v4628_v25  ;;  %v1457_v41 = vmul.f32 %v3764_v22, %v4629_v33 }
 0x3ed   :  { %4602 = vst [vmem:[#allocation45_spill] sm:$0xff] %v3943_v18  ;;  %v1585_v25 = vmul.f32 0.2, %v4022_v32  ;;  %v4052_v33 = vmul.f32 0.2, %v3880_v50 }
 0x3ee   :  { %4603 = vst [vmem:[#allocation51_spill] sm:$0xff] %v3949_v12  ;;  %v4093_v4 = vmul.f32 0.2, %v3913_v5  ;;  %v4114_v5 = vmul.f32 0.2, %v3931_v39 }
 0x3ef   :  { %4604 = vst [vmem:[#allocation52_spill] sm:$0xff] %v3952_v26  ;;  %v4134_v39 = vmul.f32 0.2, %v3949_v12  ;;  %v4154_v12 = vmul.f32 0.2, %v3967_v35 }
 0x3f0   :  { %4605 = vst [vmem:[#allocation53_spill] sm:$0xff] %v3955_v51 }
 0x3f1   :  { %4606 = vst [vmem:[#allocation54_spill] sm:$0xff] %v3958_v29 }
 0x3f2   :  { %4607 = vst [vmem:[#allocation55_spill] sm:$0xff] %v3961_v52 }
 0x3f3   :  { %4608 = vst [vmem:[#allocation56_spill] sm:$0xff] %v3964_v54 }
 0x3f4   :  { %4609 = vst [vmem:[#allocation57_spill] sm:$0xff] %v3967_v35  ;;  %v4173_v35 = vmul.f32 0.2, %v3982_v45 }
 0x3f5   :  { %4610 = vst [vmem:[#allocation58_spill] sm:$0xff] %v3970_v7 }
 0x3f6   :  { %4611 = vst [vmem:[#allocation59_spill] sm:$0xff] %v3973_v30 }
 0x3f7   :  { %4612 = vst [vmem:[#allocation60_spill] sm:$0xff] %v3976_v38 }
 0x3f8   :  { %4613 = vst [vmem:[#allocation61_spill] sm:$0xff] %v3979_v56 }
 0x3f9   :  { %4614 = vst [vmem:[#allocation62_spill] sm:$0xff] %v3982_v45  ;;  %v1665_v45 = vmax.f32 %v3880_v50, %v4052_v33 }
 0x3fa   :  { %4615 = vst [vmem:[#allocation63_spill] sm:$0xff] %v3991_v20  ;;  %v4073_v20 = vmul.f32 0.2, %v3895_v31  ;;  %v4096_v31 = vmul.f32 0.2, %v3916_v48 }
 0x3fb   :  { %4616 = vst [vmem:[#allocation64_spill] sm:$0xff] %v3994_v24  ;;  %v1586_v24 = vmul.f32 0.2, %v4026_v58  ;;  %v4117_v48 = vmul.f32 0.2, %v3934_v47 }
 0x3fc   :  { %4617 = vst [vmem:[#allocation65_spill] sm:$0xff] %v3997_v44  ;;  %v4634_v44 = vld [vmem:[#allocation27_spill] sm:$0xff] }
 0x3fd   :  { %4618 = vst [vmem:[#allocation66_spill] sm:$0xff] %v4000_v34  ;;  %v1462_v15 = vmul.f32 %v3762_v16, %v4634_v44  ;;  %v1524_v44 = vadd.f32 %v3778_v14, %v1455_v3  ;;  %v4108_v3 = vadd.f32 %v3786_v0, %v1456_v17  ;;  %v4127_v17 = vmul.f32 0.2, %v3943_v18 }
 0x3fe   :  { %4619 = vst [vmem:[#allocation67_spill] sm:$0xff] %v4003_v43  ;;  %v4633_v43 = vld [vmem:[#allocation26_spill] sm:$0xff]  ;;  %v4147_v18 = vmul.f32 0.2, %v3961_v52 }
 0x3ff   :  { %4620 = vst [vmem:[#allocation68_spill] sm:$0xff] %v4006_v60  ;;  %v4632_v60 = vld [vmem:[#allocation25_spill] sm:$0xff]  ;;  %v1461_v34 = vmul.f32 %v3764_v22, %v4633_v43  ;;  %v4065_v43 = vmul.f32 0.2, %v3889_v21  ;;  %v4083_v21 = vmul.f32 0.2, %v3904_v57 }
 0x400   :  { %4621 = vst [vmem:[#allocation69_spill] sm:$0xff] %v4009_v13  ;;  %v1459_v13 = vmul.f32 %v3764_v22, %v4631_v9  ;;  %v1460_v42 = vmul.f32 %v3762_v16, %v4632_v60  ;;  %v4059_v9 = vmul.f32 0.2, %v3883_v49  ;;  %v4062_v60 = vmul.f32 0.2, %v3886_v46 }
 0x401   :  { %4622 = vst [vmem:[#allocation70_spill] sm:$0xff] %v4012_v8  ;;  %v4080_v49 = vmul.f32 0.2, %v3901_v53  ;;  %v4102_v57 = vmul.f32 0.2, %v3922_v11 }
 0x402   :  { %4623 = vst [vmem:[#allocation71_spill] sm:$0xff] %v4015_v6  ;;  %v4630_v6 = vld [vmem:[#allocation23_spill] sm:$0xff]  ;;  %v4164_v52 = vadd.f32 %v3786_v0, %v1460_v42  ;;  %v4180_v42 = vmul.f32 0.2, %v3985_v36 }
 0x403   :  { %4624 = vst [vmem:[#allocation72_spill] sm:$0xff] %v4018_v19  ;;  %v1458_v8 = vmul.f32 %v3762_v16, %v4630_v6  ;;  %v4635_v6 = vld [vmem:[#allocation28_spill] sm:$0xff]  ;;  %v4070_v16 = vmul.f32 0.2, %v3892_v59  ;;  %v4655_v50 = vld [vmem:[#allocation65_spill] sm:$0xff] }
 0x404   :  { %4626 = vst [vmem:[#allocation19_spill] sm:$0xff] %v4031_v28  ;;  %v4056_v19 = vmul.f32 %v3764_v22, %v4635_v6  ;;  %v4076_v6 = vmul.f32 0.2, %v3898_v62  ;;  %v1523_v22 = vadd.f32 %v3786_v0, %v1454_v40  ;;  %v4090_v28 = vmul.f32 0.2, %v3910_v61 }
 0x405   :  { %4636 = vst [vmem:[#allocation20_spill] sm:$0xff] %v4065_v43  ;;  %v4086_v43 = vmul.f32 0.2, %v3907_v2  ;;  %v4099_v40 = vmul.f32 0.2, %v3919_v10  ;;  %v1649_v10 = vmax.f32 %v4022_v32, %v1585_v25  ;;  %v1527_v32 = vadd.f32 %v3786_v0, %v1458_v8 }
 0x406   :  { %v4105_v2 = vmul.f32 0.2, %v3925_v23  ;;  %4640 = vst [vmem:[#allocation24_spill] sm:$0xff] %v4114_v5  ;;  %v4124_v23 = vmul.f32 0.2, %v3940_v37  ;;  %v1528_v8 = vadd.f32 %v3778_v14, %v1459_v13 }
 0x407   :  { %4637 = vst [vmem:[#allocation21_spill] sm:$0xff] %v4086_v43  ;;  %v4111_v43 = vmul.f32 0.2, %v3928_v63  ;;  %v1650_v63 = vmax.f32 %v4026_v58, %v1586_v24  ;;  %v4137_v5 = vmul.f32 0.2, %v3952_v26  ;;  %v1526_v24 = vadd.f32 %v3778_v14, %v1457_v41 }
 0x408   :  { %4638 = vst [vmem:[#allocation22_spill] sm:$0xff] %v4099_v40  ;;  %v4121_v40 = vmul.f32 0.2, %v3937_v55  ;;  %v4141_v25 = vmul.f32 0.2, %v3955_v51 }
 0x409   :  { %4639 = vst [vmem:[#allocation23_spill] sm:$0xff] %v4111_v43  ;;  %v4131_v43 = vmul.f32 0.2, %v3946_v27  ;;  %v4144_v37 = vmul.f32 0.2, %v3958_v29 }
 0x40a   :  { %4641 = vst [vmem:[#allocation25_spill] sm:$0xff] %v4141_v25  ;;  %v4151_v58 = vmul.f32 0.2, %v3964_v54  ;;  %v4157_v26 = vmul.f32 0.2, %v3970_v7 }
 0x40b   :  { %4642 = vst [vmem:[#allocation26_spill] sm:$0xff] %v4154_v12  ;;  %v4161_v51 = vmul.f32 0.2, %v3973_v30  ;;  %v1587_v25 = vmul.f32 0.2, %v1523_v22  ;;  %v4176_v12 = vadd.f32 %v3786_v0, %v1462_v15  ;;  %v4649_v15 = vld [vmem:[#allocation63_spill] sm:$0xff] }
 0x40c   :  { %v1588_v29 = vmul.f32 0.2, %v1524_v44  ;;  %4644 = vst [vmem:[#allocation28_spill] sm:$0xff] %v4164_v52  ;;  %v4167_v41 = vmul.f32 0.2, %v3976_v38 }
 0x40d   :  { %4643 = vst [vmem:[#allocation27_spill] sm:$0xff] %v4161_v51  ;;  %v4170_v54 = vmul.f32 0.2, %v3979_v56  ;;  %v1651_v13 = vmax.f32 %v1523_v22, %v1587_v25  ;;  %v1589_v51 = vmul.f32 0.2, %v4108_v3  ;;  %v1667_v22 = vmax.f32 %v3886_v46, %v4062_v60  ;;  %v4651_v25 = vld [vmem:[#allocation72_spill] sm:$0xff] }
 0x40e   :  { %4645 = vst [vmem:[#allocation73_spill] sm:$0xff] %v4167_v41  ;;  %v1652_v30 = vmax.f32 %v1524_v44, %v1588_v29  ;;  %v1591_v7 = vmul.f32 0.2, %v1527_v32  ;;  %v1590_v52 = vmul.f32 0.2, %v1526_v24  ;;  %v4183_v41 = vadd.f32 %v3778_v14, %v1461_v34  ;;  %v4656_v60 = vld [vmem:[#allocation66_spill] sm:$0xff] }
 0x40f   :  { %4646 = vst [vmem:[#allocation74_spill] sm:$0xff] %v4170_v54  ;;  %v1592_v38 = vmul.f32 0.2, %v1528_v8  ;;  %v1713_v56 = vpack.c.bf16 %v1651_v13, %v1649_v10  ;;  %v4190_v29 = vmul.f32 0.2, %v3988_v1  ;;  %v4200_v34 = vadd.f32 %v3778_v14, %v4056_v19  ;;  %v4654_v10 = vld [vmem:[#allocation64_spill] sm:$0xff] }
 0x410   :  { %4647 = vst [vmem:[#allocation75_spill] sm:$0xff] %v4176_v12  ;;  %v1714_v54 = vpack.c.bf16 %v1652_v30, %v1650_v63  ;;  %v4193_v44 = vmul.f32 0.2, %v4649_v15  ;;  %v4196_v0 = vmul.f32 0.2, %v4651_v25  ;;  %v1653_v46 = vmax.f32 %v4108_v3, %v1589_v51  ;;  %v4657_v15 = vld [vmem:[#allocation33_spill] sm:$0xff] }
 0x411   :  { %4648 = vst [vmem:[#allocation76_spill] sm:$0xff] %v4183_v41  ;;  %v4203_v63 = vmul.f32 0.2, %v4654_v10  ;;  %v4206_v30 = vmul.f32 0.2, %v4655_v50  ;;  %1884 = vmatmul.bf16.vlgmr.msrb.gmra.mxu0 %v1713_v56  ;;  %v1655_v33 = vmax.f32 %v1527_v32, %v1591_v7  ;;  %v1654_v41 = vmax.f32 %v1526_v24, %v1590_v52  ;;  %v4658_v14 = vld [vmem:[#allocation67_spill] sm:$0xff] }
 0x412   :  { %4650 = vst [vmem:[#allocation77_spill] sm:$0xff] %v4193_v44  ;;  %1973 = vmatmul.bf16.vlgmr.msrb.gmra.mxu1 %v1714_v54  ;;  %v4210_v13 = vmul.f32 0.2, %v4656_v60  ;;  %v1656_v12 = vmax.f32 %v1528_v8, %v1592_v38  ;;  %v1666_v19 = vmax.f32 %v4657_v15, %v4059_v9  ;;  %v4659_v44 = vld [vmem:[#allocation68_spill] sm:$0xff]  ;;  %v4660_v50 = vld [vmem:[#allocation69_spill] sm:$0xff]  ;;  %v4223_v54 = vpack.c.bf16 %v1667_v22, %v1665_v45  ;;  %v4662_v51 = vld [vmem:[#allocation70_spill] sm:$0xff] }
 0x413   :  { %4652 = vst [vmem:[#allocation72_spill] sm:$0xff] %v4196_v0  ;;  %v4218_v10 = vmul.f32 0.2, %v4659_v44  ;;  %v4221_v56 = vmul.f32 0.2, %v4660_v50  ;;  %v4664_v3 = vld [vmem:[#allocation71_spill] sm:$0xff]  ;;  %v1715_v8 = vpack.c.bf16 %v1655_v33, %v1653_v46  ;;  %v1669_v15 = vmax.f32 %v3892_v59, %v4070_v16 }
 0x414   :  { %4653 = vst [vmem:[#allocation78_spill] sm:$0xff] %v4200_v34  ;;  %v4215_v34 = vmul.f32 0.2, %v4658_v14  ;;  %v4226_v7 = vmul.f32 0.2, %v4662_v51  ;;  %v4665_v9 = vld [vmem:[#allocation20_spill] sm:$0xff]  ;;  %v1671_v45 = vmax.f32 %v3898_v62, %v4076_v6  ;;  %v1716_v51 = vpack.c.bf16 %v1656_v12, %v1654_v41 }
 0x415   :  { %4661 = vst [vmem:[#allocation66_spill] sm:$0xff] %v4223_v54  ;;  %v4229_v52 = vmul.f32 0.2, %v4664_v3  ;;  %v4666_v32 = vld [vmem:[#allocation36_spill] sm:$0xff]  ;;  %v4667_v22 = vld [vmem:[#allocation37_spill] sm:$0xff]  ;;  %v1672_v3 = vmax.f32 %v3901_v53, %v4080_v49  ;;  %v4668_v38 = vld [vmem:[#allocation38_spill] sm:$0xff]  ;;  %v1675_v16 = vmax.f32 %v3910_v61, %v4090_v28  ;;  %v1679_v49 = vmax.f32 %v3922_v11, %v4102_v57 }
 0x416   :  { %4663 = vst [vmem:[#allocation33_spill] sm:$0xff] %v4226_v7  ;;  %v1668_v24 = vmax.f32 %v4666_v32, %v4665_v9  ;;  %v1670_v54 = vmax.f32 %v4667_v22, %v4073_v20  ;;  %v1673_v0 = vmax.f32 %v4668_v38, %v4083_v21  ;;  %v4247_v9 = vpack.c.bf16 %v1671_v45, %v1669_v15  ;;  %v4669_v59 = vld [vmem:[#allocation21_spill] sm:$0xff]  ;;  %v4670_v46 = vld [vmem:[#allocation39_spill] sm:$0xff]  ;;  %v4671_v6 = vld [vmem:[#allocation40_spill] sm:$0xff] }
 0x417   :  { %v1674_v62 = vmax.f32 %v4670_v46, %v4669_v59  ;;  %v1676_v20 = vmax.f32 %v4671_v6, %v4093_v4  ;;  %v4672_v41 = vld [vmem:[#allocation41_spill] sm:$0xff]  ;;  %v4673_v21 = vld [vmem:[#allocation22_spill] sm:$0xff]  ;;  %v4677_v4 = vld [vmem:[#allocation35_spill] sm:$0xff] }
 0x418   :  { %v4241_v7 = vpack.c.bf16 %v1668_v24, %v1666_v19  ;;  %v4255_v12 = vpack.c.bf16 %v1672_v3, %v1670_v54  ;;  %v1677_v33 = vmax.f32 %v4672_v41, %v4096_v31  ;;  %v4674_v53 = vld [vmem:[#allocation42_spill] sm:$0xff]  ;;  %v4263_v38 = vpack.c.bf16 %v1675_v16, %v1673_v0  ;;  %v4676_v24 = vld [vmem:[#allocation23_spill] sm:$0xff]  ;;  %v4678_v15 = vld [vmem:[#allocation24_spill] sm:$0xff] }
 0x419   :  { %v1678_v19 = vmax.f32 %v4674_v53, %v4673_v21  ;;  %v4265_v61 = vpack.c.bf16 %v1676_v20, %v1674_v62  ;;  %v4675_v28 = vld [vmem:[#allocation34_spill] sm:$0xff]  ;;  %v1681_v54 = vmax.f32 %v4677_v4, %v4676_v24  ;;  %v1683_v31 = vmax.f32 %v3934_v47, %v4117_v48  ;;  %v4679_v57 = vld [vmem:[#allocation43_spill] sm:$0xff]  ;;  %v4680_v22 = vld [vmem:[#allocation44_spill] sm:$0xff] }
 0x41a   :  { %v1680_v32 = vmax.f32 %v4675_v28, %v4105_v2  ;;  %v4271_v3 = vpack.c.bf16 %v1679_v49, %v1677_v33  ;;  %v1682_v11 = vmax.f32 %v4679_v57, %v4678_v15  ;;  %v1684_v0 = vmax.f32 %v3937_v55, %v4121_v40  ;;  %v4681_v59 = vld [vmem:[#allocation45_spill] sm:$0xff]  ;;  %v4682_v47 = vld [vmem:[#allocation51_spill] sm:$0xff]  ;;  %v4683_v55 = vld [vmem:[#allocation52_spill] sm:$0xff] }
 0x41b   :  { %v1685_v16 = vmax.f32 %v4680_v22, %v4124_v23  ;;  %v1687_v2 = vmax.f32 %v3946_v27, %v4131_v43  ;;  %v1686_v46 = vmax.f32 %v4681_v59, %v4127_v17  ;;  %v4287_v62 = vpack.c.bf16 %v1683_v31, %v1681_v54  ;;  %v4684_v23 = vld [vmem:[#allocation54_spill] sm:$0xff]  ;;  %v4685_v33 = vld [vmem:[#allocation25_spill] sm:$0xff]  ;;  %v4687_v17 = vld [vmem:[#allocation55_spill] sm:$0xff] }
 0x41c   :  { %v4279_v45 = vpack.c.bf16 %v1680_v32, %v1678_v19  ;;  %v4289_v48 = vpack.c.bf16 %v1684_v0, %v1682_v11  ;;  %v1688_v6 = vmax.f32 %v4682_v47, %v4134_v39  ;;  %v1689_v40 = vmax.f32 %v4683_v55, %v4137_v5  ;;  %v4686_v27 = vld [vmem:[#allocation53_spill] sm:$0xff]  ;;  %v4688_v53 = vld [vmem:[#allocation56_spill] sm:$0xff]  ;;  %v4689_v39 = vld [vmem:[#allocation58_spill] sm:$0xff] }
 0x41d   :  { %v4295_v20 = vpack.c.bf16 %v1687_v2, %v1685_v16  ;;  %v1691_v41 = vmax.f32 %v4684_v23, %v4144_v37  ;;  %v1690_v43 = vmax.f32 %v4686_v27, %v4685_v33  ;;  %v1692_v49 = vmax.f32 %v4687_v17, %v4147_v18  ;;  %v4690_v5 = vld [vmem:[#allocation26_spill] sm:$0xff]  ;;  %v4691_v32 = vld [vmem:[#allocation57_spill] sm:$0xff]  ;;  %v4692_v54 = vld [vmem:[#allocation27_spill] sm:$0xff] }
 0x41e   :  { %v4303_v21 = vpack.c.bf16 %v1688_v6, %v1686_v46  ;;  %v1693_v19 = vmax.f32 %v4688_v53, %v4151_v58  ;;  %v1695_v28 = vmax.f32 %v4689_v39, %v4157_v26  ;;  %v1694_v24 = vmax.f32 %v4691_v32, %v4690_v5  ;;  %v4693_v31 = vld [vmem:[#allocation59_spill] sm:$0xff]  ;;  %v4694_v57 = vld [vmem:[#allocation73_spill] sm:$0xff]  ;;  %v4695_v18 = vld [vmem:[#allocation60_spill] sm:$0xff] }
 0x41f   :  { %v4311_v4 = vpack.c.bf16 %v1691_v41, %v1689_v40  ;;  %v4313_v37 = vpack.c.bf16 %v1692_v49, %v1690_v43  ;;  %v1696_v15 = vmax.f32 %v4693_v31, %v4692_v54  ;;  %v1697_v11 = vmax.f32 %v4695_v18, %v4694_v57  ;;  %v4696_v58 = vld [vmem:[#allocation62_spill] sm:$0xff]  ;;  %v4698_v26 = vld [vmem:[#allocation61_spill] sm:$0xff]  ;;  %v4699_v6 = vld [vmem:[#allocation64_spill] sm:$0xff] }
 0x420   :  { %v4319_v0 = vpack.c.bf16 %v1695_v28, %v1693_v19  ;;  %v1699_v22 = vmax.f32 %v4696_v58, %v4173_v35  ;;  %v4697_v16 = vld [vmem:[#allocation74_spill] sm:$0xff]  ;;  %v1700_v59 = vmax.f32 %v3985_v36, %v4180_v42  ;;  %v1701_v47 = vmax.f32 %v3988_v1, %v4190_v29  ;;  %v4700_v35 = vld [vmem:[#allocation77_spill] sm:$0xff]  ;;  %v4701_v41 = vld [vmem:[#allocation63_spill] sm:$0xff] }
 0x421   :  { %v1698_v2 = vmax.f32 %v4698_v26, %v4697_v16  ;;  %1889 = vmatmul.bf16.gmra.mxu0 %v1715_v8  ;;  %v4327_v46 = vpack.c.bf16 %v1696_v15, %v1694_v24  ;;  %v1703_v55 = vmax.f32 %v4699_v6, %v4203_v63  ;;  %v1702_v33 = vmax.f32 %v4701_v41, %v4700_v35  ;;  %v4702_v27 = vld [vmem:[#allocation65_spill] sm:$0xff]  ;;  %v4704_v17 = vld [vmem:[#allocation70_spill] sm:$0xff]  ;;  %v4710_v28 = vld [vmem:[#allocation19_spill] sm:$0xff] }
 0x422   :  { %1978 = vmatmul.bf16.gmra.mxu1 %v1716_v51  ;;  %v4333_v40 = vpack.c.bf16 %v1699_v22, %v1697_v11  ;;  %v1704_v36 = vmax.f32 %v4702_v27, %v4206_v30  ;;  %v1705_v51 = vmax.f32 %v4656_v60, %v4210_v13  ;;  %v1707_v1 = vmax.f32 %v4659_v44, %v4218_v10  ;;  %v4703_v43 = vld [vmem:[#allocation33_spill] sm:$0xff]  ;;  %v4705_v30 = vld [vmem:[#allocation71_spill] sm:$0xff]  ;;  %v4706_v60 = vld [vmem:[#allocation28_spill] sm:$0xff] }
 0x423   :  { %v4335_v23 = vpack.c.bf16 %v1700_v59, %v1698_v2  ;;  %v4341_v42 = vpack.c.bf16 %v1703_v55, %v1701_v47  ;;  %v1706_v29 = vmax.f32 %v4658_v14, %v4215_v34  ;;  %v1708_v8 = vmax.f32 %v4660_v50, %v4221_v56  ;;  %v4707_v44 = vld [vmem:[#allocation72_spill] sm:$0xff]  ;;  %v4709_v10 = vld [vmem:[#allocation50_spill] sm:$0xff]  ;;  %v4712_v5 = vld [vmem:[#allocation75_spill] sm:$0xff] }
 0x424   :  { %v4349_v63 = vpack.c.bf16 %v1704_v36, %v1702_v33  ;;  %v1709_v49 = vmax.f32 %v4704_v17, %v4703_v43  ;;  %v1710_v53 = vmax.f32 %v4705_v30, %v4229_v52  ;;  %v4357_v19 = vpack.c.bf16 %v1707_v1, %v1705_v51  ;;  %v4713_v24 = vld [vmem:[#allocation76_spill] sm:$0xff]  ;;  %v4714_v54 = vld [vmem:[#allocation78_spill] sm:$0xff]  ;;  %v4715_v22 = vld [vmem:[#allocation29_spill] sm:$0xff] }
 0x425   :  { %v1593_v13 = vmul.f32 0.2, %v4706_v60  ;;  %v4360_v39 = vpack.c.bf16 %v1708_v8, %v1706_v29  ;;  %v4708_v14 = vmax.f32 %v4651_v25, %v4707_v44  ;;  %v4711_v50 = vmax.f32 %v4709_v10, %v4710_v28  ;;  %v4716_v16 = vld [vmem:[#allocation46_spill] sm:$0xff]  ;;  %v4718_v59 = vld [vmem:[#allocation47_spill] sm:$0xff]  ;;  %v4720_v35 = vld [vmem:[#allocation32_spill] sm:$0xff] }
 0x426   :  { %v1595_v32 = vmul.f32 0.2, %v4712_v5  ;;  %v1594_v52 = vmul.f32 0.2, %v4713_v24  ;;  %v1596_v31 = vmul.f32 0.2, %v4714_v54  ;;  %v1464_v26 = vmul.f32 %v4716_v16, %v4715_v22 }
 0x427   :  { %v4365_v34 = vpack.c.bf16 %v4708_v14, %v1709_v49  ;;  %v4370_v56 = vpack.c.bf16 %v4711_v50, %v1710_v53  ;;  %v1657_v15 = vmax.f32 %v4706_v60, %v1593_v13  ;;  %v4717_v2 = vld [vmem:[#allocation30_spill] sm:$0xff]  ;;  %v4719_v6 = vld [vmem:[#allocation31_spill] sm:$0xff]  ;;  %v1467_v41 = vmul.f32 %v4718_v59, %v4720_v35  ;;  %v4721_v33 = vld [vmem:[#allocation49_spill] sm:$0xff] }
 0x428   :  { %v1659_v57 = vmax.f32 %v4712_v5, %v1595_v32  ;;  %v1658_v18 = vmax.f32 %v4713_v24, %v1594_v52  ;;  %v1660_v25 = vmax.f32 %v4714_v54, %v1596_v31  ;;  %v1465_v47 = vmul.f32 %v4718_v59, %v4717_v2  ;;  %v4722_v51 = vld [vmem:[#allocation48_spill] sm:$0xff]  ;;  %v4723_v10 = vld [vmem:[#allocation66_spill] sm:$0xff] }
 0x429   :  { %v1466_v55 = vmul.f32 %v4716_v16, %v4719_v6  ;;  %v1533_v27 = vadd.f32 %v4721_v33, %v1464_v26  ;;  %v1536_v29 = vadd.f32 %v4722_v51, %v1467_v41  ;;  %v4399_v28 = vld [vmem:[#allocation11 + $0x7] ss:$0 sm:$0xff] }
 0x42a   :  { %v1717_v11 = vpack.c.bf16 %v1659_v57, %v1657_v15  ;;  %v1718_v58 = vpack.c.bf16 %v1660_v25, %v1658_v18  ;;  %v1534_v1 = vadd.f32 %v4722_v51, %v1465_v47 }
 0x42b   :  { %v1535_v36 = vadd.f32 %v4721_v33, %v1466_v55  ;;  %v1597_v8 = vmul.f32 0.2, %v1533_v27  ;;  %v1600_v49 = vmul.f32 0.2, %v1536_v29 }
 0x42c   :  { %v1598_v17 = vmul.f32 0.2, %v1534_v1 }
 0x42d   :  { %v1599_v43 = vmul.f32 0.2, %v1535_v36  ;;  %v1661_v30 = vmax.f32 %v1533_v27, %v1597_v8  ;;  %v1664_v13 = vmax.f32 %v1536_v29, %v1600_v49 }
 0x42e   :  { %v1662_v60 = vmax.f32 %v1534_v1, %v1598_v17 }
 0x42f   :  { %v1663_v53 = vmax.f32 %v1535_v36, %v1599_v43 }
 0x430   :  { %v1720_v14 = vpack.c.bf16 %v1664_v13, %v1662_v60 }
 0x431   :  { %1894 = vmatmul.bf16.gmra.mxu0 %v1717_v11  ;;  %v1719_v44 = vpack.c.bf16 %v1663_v53, %v1661_v30 }
 0x432   :  { %1983 = vmatmul.bf16.gmra.mxu1 %v1718_v58 }
 0x441   :  { %1899 = vmatmul.bf16.gmra.mxu0 %v1719_v44 }
 0x442   :  { %1988 = vmatmul.bf16.gmra.mxu1 %v1720_v14 }
 0x451   :  { %1904 = vmatmul.bf16.gmra.mxu0 %v4723_v10 }
 0x452   :  { %1993 = vmatmul.bf16.gmra.mxu1 %v4241_v7 }
 0x461   :  { %1909 = vmatmul.bf16.gmra.mxu0 %v4247_v9 }
 0x462   :  { %1998 = vmatmul.bf16.gmra.mxu1 %v4255_v12 }
 0x471   :  { %1914 = vmatmul.bf16.gmra.mxu0 %v4263_v38 }
 0x472   :  { %2003 = vmatmul.bf16.gmra.mxu1 %v4265_v61 }
 0x481   :  { %1919 = vmatmul.bf16.gmra.mxu0 %v4271_v3 }
 0x482   :  { %2008 = vmatmul.bf16.gmra.mxu1 %v4279_v45 }
 0x48e   :  { %v1885_v50 = vpop.f32.mrf.mxu0 }
 0x48f   :  { %v1974_v5 = vpop.f32.mrf.mxu1  ;;  %v1886_v32 = vadd.f32 %v4399_v28, %v1885_v50 }
 0x491   :  { %v1975_v24 = vadd.f32 %v1974_v5, %v1886_v32  ;;  %1924 = vmatmul.bf16.gmra.mxu0 %v4287_v62 }
 0x492   :  { %2013 = vmatmul.bf16.gmra.mxu1 %v4289_v48 }
 0x493   :  { %v2054_v7 = vmul.f32 0.5, %v1975_v24 }
 0x495   :  { %2718 = vtanh.f32 %v2054_v7 }
 0x496   :  { %v1887_v9 = vpop.f32.mrf.mxu0 }
 0x497   :  { %v1976_v12 = vpop.f32.mrf.mxu1  ;;  %v1888_v38 = vadd.f32 %v4399_v28, %v1887_v9 }
 0x499   :  { %v1977_v61 = vadd.f32 %v1976_v12, %v1888_v38 }
 0x49b   :  { %v2055_v3 = vmul.f32 0.5, %v1977_v61  ;;  %v2719_v54 = vpop.eup %2718 }
 0x49c   :  { %v2118_v62 = vadd.f32 1.0, %v2719_v54 }
 0x49d   :  { %2720 = vtanh.f32 %v2055_v3 }
 0x49e   :  { %v1890_v45 = vpop.f32.mrf.mxu0  ;;  %v2150_v25 = vmul.f32 0.5, %v2118_v62 }
 0x49f   :  { %v1979_v52 = vpop.f32.mrf.mxu1  ;;  %v1891_v31 = vadd.f32 %v4399_v28, %v1890_v45 }
 0x4a1   :  { %v1980_v15 = vadd.f32 %v1979_v52, %v1891_v31  ;;  %1929 = vmatmul.bf16.gmra.mxu0 %v4295_v20 }
 0x4a2   :  { %2018 = vmatmul.bf16.gmra.mxu1 %v4303_v21 }
 0x4a3   :  { %v2721_v48 = vpop.eup %2720  ;;  %v2056_v18 = vmul.f32 0.5, %v1980_v15 }
 0x4a4   :  { %v2119_v57 = vadd.f32 1.0, %v2721_v48 }
 0x4a5   :  { %2722 = vtanh.f32 %v2056_v18 }
 0x4a6   :  { %v2151_v11 = vmul.f32 0.5, %v2119_v57  ;;  %v1892_v58 = vpop.f32.mrf.mxu0 }
 0x4a7   :  { %v1981_v22 = vpop.f32.mrf.mxu1  ;;  %v1893_v16 = vadd.f32 %v4399_v28, %v1892_v58 }
 0x4a8   :  { %v2591_v26 = vpack.c.bf16 %v2151_v11, %v2150_v25 }
 0x4a9   :  { %v1982_v2 = vadd.f32 %v1981_v22, %v1893_v16 }
 0x4aa   :  { %2592 = vst [vmem:[#allocation13] sm:$0xff] %v2591_v26  }
 0x4ab   :  { %v2057_v59 = vmul.f32 0.5, %v1982_v2  ;;  %v2723_v6 = vpop.eup %2722 }
 0x4ac   :  { %v2120_v35 = vadd.f32 1.0, %v2723_v6 }
 0x4ad   :  { %2724 = vtanh.f32 %v2057_v59 }
 0x4ae   :  { %v1895_v47 = vpop.f32.mrf.mxu0  ;;  %v2152_v36 = vmul.f32 0.5, %v2120_v35 }
 0x4af   :  { %v1984_v20 = vpop.f32.mrf.mxu1  ;;  %v1896_v21 = vadd.f32 %v4399_v28, %v1895_v47 }
 0x4b1   :  { %v1985_v55 = vadd.f32 %v1984_v20, %v1896_v21  ;;  %1934 = vmatmul.bf16.gmra.mxu0 %v4311_v4 }
 0x4b2   :  { %2023 = vmatmul.bf16.gmra.mxu1 %v4313_v37 }
 0x4b3   :  { %v2725_v41 = vpop.eup %2724  ;;  %v2058_v27 = vmul.f32 0.5, %v1985_v55 }
 0x4b4   :  { %v2121_v33 = vadd.f32 1.0, %v2725_v41 }
 0x4b5   :  { %2726 = vtanh.f32 %v2058_v27 }
 0x4b6   :  { %v2153_v51 = vmul.f32 0.5, %v2121_v33  ;;  %v1897_v1 = vpop.f32.mrf.mxu0 }
 0x4b7   :  { %v1986_v29 = vpop.f32.mrf.mxu1  ;;  %v1898_v8 = vadd.f32 %v4399_v28, %v1897_v1 }
 0x4b8   :  { %v2596_v43 = vpack.c.bf16 %v2153_v51, %v2152_v36 }
 0x4b9   :  { %v1987_v17 = vadd.f32 %v1986_v29, %v1898_v8 }
 0x4ba   :  { %2668 = vst [vmem:[#allocation13 + $0x8] sm:$0xff] %v2596_v43  }
 0x4bb   :  { %v2059_v49 = vmul.f32 0.5, %v1987_v17  ;;  %v2727_v53 = vpop.eup %2726 }
 0x4bc   :  { %v2122_v13 = vadd.f32 1.0, %v2727_v53 }
 0x4bd   :  { %2728 = vtanh.f32 %v2059_v49 }
 0x4be   :  { %v1900_v30 = vpop.f32.mrf.mxu0  ;;  %v2154_v50 = vmul.f32 0.5, %v2122_v13 }
 0x4bf   :  { %v1989_v4 = vpop.f32.mrf.mxu1  ;;  %v1901_v37 = vadd.f32 %v4399_v28, %v1900_v30 }
 0x4c1   :  { %v1990_v60 = vadd.f32 %v1989_v4, %v1901_v37  ;;  %1939 = vmatmul.bf16.gmra.mxu0 %v4319_v0 }
 0x4c2   :  { %2028 = vmatmul.bf16.gmra.mxu1 %v4327_v46 }
 0x4c3   :  { %v2729_v44 = vpop.eup %2728  ;;  %v2060_v10 = vmul.f32 0.5, %v1990_v60 }
 0x4c4   :  { %v2123_v14 = vadd.f32 1.0, %v2729_v44 }
 0x4c5   :  { %2730 = vtanh.f32 %v2060_v10 }
 0x4c6   :  { %v2155_v5 = vmul.f32 0.5, %v2123_v14  ;;  %v1902_v32 = vpop.f32.mrf.mxu0 }
 0x4c7   :  { %v1991_v24 = vpop.f32.mrf.mxu1  ;;  %v1903_v7 = vadd.f32 %v4399_v28, %v1902_v32 }
 0x4c8   :  { %v2601_v9 = vpack.c.bf16 %v2155_v5, %v2154_v50 }
 0x4c9   :  { %v1992_v12 = vadd.f32 %v1991_v24, %v1903_v7 }
 0x4ca   :  { %2669 = vst [vmem:[#allocation13 + $0x10] sm:$0xff] %v2601_v9  }
 0x4cb   :  { %v2061_v38 = vmul.f32 0.5, %v1992_v12  ;;  %v2731_v3 = vpop.eup %2730 }
 0x4cc   :  { %v2124_v52 = vadd.f32 1.0, %v2731_v3 }
 0x4cd   :  { %2732 = vtanh.f32 %v2061_v38 }
 0x4ce   :  { %v1905_v61 = vpop.f32.mrf.mxu0  ;;  %v2156_v62 = vmul.f32 0.5, %v2124_v52 }
 0x4cf   :  { %v1994_v0 = vpop.f32.mrf.mxu1  ;;  %v1906_v46 = vadd.f32 %v4399_v28, %v1905_v61 }
 0x4d1   :  { %v1995_v45 = vadd.f32 %v1994_v0, %v1906_v46  ;;  %1944 = vmatmul.bf16.gmra.mxu0 %v4333_v40 }
 0x4d2   :  { %2033 = vmatmul.bf16.gmra.mxu1 %v4335_v23 }
 0x4d3   :  { %v2733_v54 = vpop.eup %2732  ;;  %v2062_v15 = vmul.f32 0.5, %v1995_v45 }
 0x4d4   :  { %v2125_v31 = vadd.f32 1.0, %v2733_v54 }
 0x4d5   :  { %2734 = vtanh.f32 %v2062_v15 }
 0x4d6   :  { %v2157_v48 = vmul.f32 0.5, %v2125_v31  ;;  %v1907_v57 = vpop.f32.mrf.mxu0 }
 0x4d7   :  { %v1996_v18 = vpop.f32.mrf.mxu1  ;;  %v1908_v25 = vadd.f32 %v4399_v28, %v1907_v57 }
 0x4d8   :  { %v2606_v11 = vpack.c.bf16 %v2157_v48, %v2156_v62 }
 0x4d9   :  { %v1997_v58 = vadd.f32 %v1996_v18, %v1908_v25 }
 0x4da   :  { %2670 = vst [vmem:[#allocation13 + $0x18] sm:$0xff] %v2606_v11  }
 0x4db   :  { %v2063_v22 = vmul.f32 0.5, %v1997_v58  ;;  %v2735_v26 = vpop.eup %2734 }
 0x4dc   :  { %v2126_v59 = vadd.f32 1.0, %v2735_v26 }
 0x4dd   :  { %2736 = vtanh.f32 %v2063_v22 }
 0x4de   :  { %v1910_v16 = vpop.f32.mrf.mxu0  ;;  %v2158_v21 = vmul.f32 0.5, %v2126_v59 }
 0x4df   :  { %v1999_v40 = vpop.f32.mrf.mxu1  ;;  %v1911_v23 = vadd.f32 %v4399_v28, %v1910_v16 }
 0x4e1   :  { %v2000_v2 = vadd.f32 %v1999_v40, %v1911_v23  ;;  %1949 = vmatmul.bf16.gmra.mxu0 %v4341_v42 }
 0x4e2   :  { %2038 = vmatmul.bf16.gmra.mxu1 %v4349_v63 }
 0x4e3   :  { %v2737_v47 = vpop.eup %2736  ;;  %v2064_v6 = vmul.f32 0.5, %v2000_v2 }
 0x4e4   :  { %v2127_v20 = vadd.f32 1.0, %v2737_v47 }
 0x4e5   :  { %2738 = vtanh.f32 %v2064_v6 }
 0x4e6   :  { %v2159_v55 = vmul.f32 0.5, %v2127_v20  ;;  %v1912_v35 = vpop.f32.mrf.mxu0 }
 0x4e7   :  { %v2001_v41 = vpop.f32.mrf.mxu1  ;;  %v1913_v33 = vadd.f32 %v4399_v28, %v1912_v35 }
 0x4e8   :  { %v2611_v27 = vpack.c.bf16 %v2159_v55, %v2158_v21 }
 0x4e9   :  { %v2002_v36 = vadd.f32 %v2001_v41, %v1913_v33 }
 0x4ea   :  { %2671 = vst [vmem:[#allocation13 + $0x20] sm:$0xff] %v2611_v27  }
 0x4eb   :  { %v2065_v51 = vmul.f32 0.5, %v2002_v36  ;;  %v2739_v29 = vpop.eup %2738 }
 0x4ec   :  { %v2128_v43 = vadd.f32 1.0, %v2739_v29 }
 0x4ed   :  { %2740 = vtanh.f32 %v2065_v51 }
 0x4ee   :  { %v1915_v1 = vpop.f32.mrf.mxu0  ;;  %v2160_v4 = vmul.f32 0.5, %v2128_v43 }
 0x4ef   :  { %v2004_v42 = vpop.f32.mrf.mxu1  ;;  %v1916_v63 = vadd.f32 %v4399_v28, %v1915_v1 }
 0x4f1   :  { %v2005_v8 = vadd.f32 %v2004_v42, %v1916_v63  ;;  %1954 = vmatmul.bf16.gmra.mxu0 %v4357_v19 }
 0x4f2   :  { %2043 = vmatmul.bf16.gmra.mxu1 %v4360_v39 }
 0x4f3   :  { %v2741_v17 = vpop.eup %2740  ;;  %v2066_v30 = vmul.f32 0.5, %v2005_v8 }
 0x4f4   :  { %v2129_v49 = vadd.f32 1.0, %v2741_v17 }
 0x4f5   :  { %2742 = vtanh.f32 %v2066_v30 }
 0x4f6   :  { %v2161_v53 = vmul.f32 0.5, %v2129_v49  ;;  %v1917_v37 = vpop.f32.mrf.mxu0 }
 0x4f7   :  { %v2006_v60 = vpop.f32.mrf.mxu1  ;;  %v1918_v13 = vadd.f32 %v4399_v28, %v1917_v37 }
 0x4f8   :  { %v2616_v44 = vpack.c.bf16 %v2161_v53, %v2160_v4 }
 0x4f9   :  { %v2007_v14 = vadd.f32 %v2006_v60, %v1918_v13 }
 0x4fa   :  { %2672 = vst [vmem:[#allocation13 + $0x28] sm:$0xff] %v2616_v44  }
 0x4fb   :  { %v2067_v10 = vmul.f32 0.5, %v2007_v14  ;;  %v2743_v5 = vpop.eup %2742 }
 0x4fc   :  { %v2130_v24 = vadd.f32 1.0, %v2743_v5 }
 0x4fd   :  { %2744 = vtanh.f32 %v2067_v10 }
 0x4fe   :  { %v1920_v50 = vpop.f32.mrf.mxu0  ;;  %v2162_v38 = vmul.f32 0.5, %v2130_v24 }
 0x4ff   :  { %v2009_v19 = vpop.f32.mrf.mxu1  ;;  %v1921_v39 = vadd.f32 %v4399_v28, %v1920_v50 }
 0x501   :  { %v2010_v32 = vadd.f32 %v2009_v19, %v1921_v39  ;;  %1959 = vmatmul.bf16.gmra.mxu0 %v4365_v34 }
 0x502   :  { %2048 = vmatmul.bf16.gmra.mxu1 %v4370_v56 }
 0x503   :  { %v2745_v7 = vpop.eup %2744  ;;  %v2068_v12 = vmul.f32 0.5, %v2010_v32 }
 0x504   :  { %v2131_v9 = vadd.f32 1.0, %v2745_v7 }
 0x505   :  { %2746 = vtanh.f32 %v2068_v12 }
 0x506   :  { %v2163_v61 = vmul.f32 0.5, %v2131_v9  ;;  %v1922_v0 = vpop.f32.mrf.mxu0 }
 0x507   :  { %v2011_v3 = vpop.f32.mrf.mxu1  ;;  %v1923_v46 = vadd.f32 %v4399_v28, %v1922_v0 }
 0x508   :  { %v2621_v45 = vpack.c.bf16 %v2163_v61, %v2162_v38 }
 0x509   :  { %v2012_v52 = vadd.f32 %v2011_v3, %v1923_v46 }
 0x50a   :  { %2673 = vst [vmem:[#allocation13 + $0x30] sm:$0xff] %v2621_v45  }
 0x50b   :  { %v2069_v54 = vmul.f32 0.5, %v2012_v52  ;;  %v2747_v15 = vpop.eup %2746 }
 0x50c   :  { %v2132_v48 = vadd.f32 1.0, %v2747_v15 }
 0x50d   :  { %2748 = vtanh.f32 %v2069_v54 }
 0x50e   :  { %v1925_v31 = vpop.f32.mrf.mxu0  ;;  %v2164_v11 = vmul.f32 0.5, %v2132_v48 }
 0x50f   :  { %v2014_v34 = vpop.f32.mrf.mxu1  ;;  %v1926_v56 = vadd.f32 %v4399_v28, %v1925_v31 }
 0x511   :  { %v2015_v62 = vadd.f32 %v2014_v34, %v1926_v56 }
 0x513   :  { %v2749_v57 = vpop.eup %2748  ;;  %v2070_v25 = vmul.f32 0.5, %v2015_v62 }
 0x514   :  { %v2133_v18 = vadd.f32 1.0, %v2749_v57 }
 0x515   :  { %2750 = vtanh.f32 %v2070_v25 }
 0x516   :  { %v2165_v58 = vmul.f32 0.5, %v2133_v18  ;;  %v1927_v22 = vpop.f32.mrf.mxu0 }
 0x517   :  { %v2016_v16 = vpop.f32.mrf.mxu1  ;;  %v1928_v40 = vadd.f32 %v4399_v28, %v1927_v22 }
 0x518   :  { %v2626_v26 = vpack.c.bf16 %v2165_v58, %v2164_v11 }
 0x519   :  { %v2017_v23 = vadd.f32 %v2016_v16, %v1928_v40 }
 0x51a   :  { %2674 = vst [vmem:[#allocation13 + $0x38] sm:$0xff] %v2626_v26  }
 0x51b   :  { %v2071_v2 = vmul.f32 0.5, %v2017_v23  ;;  %v2751_v20 = vpop.eup %2750 }
 0x51c   :  { %v2134_v55 = vadd.f32 1.0, %v2751_v20 }
 0x51d   :  { %2752 = vtanh.f32 %v2071_v2 }
 0x51e   :  { %v1930_v59 = vpop.f32.mrf.mxu0  ;;  %v2166_v27 = vmul.f32 0.5, %v2134_v55 }
 0x51f   :  { %v2019_v47 = vpop.f32.mrf.mxu1  ;;  %v1931_v6 = vadd.f32 %v4399_v28, %v1930_v59 }
 0x521   :  { %v2020_v21 = vadd.f32 %v2019_v47, %v1931_v6 }
 0x523   :  { %v2753_v35 = vpop.eup %2752  ;;  %v2072_v33 = vmul.f32 0.5, %v2020_v21 }
 0x524   :  { %v2135_v41 = vadd.f32 1.0, %v2753_v35 }
 0x525   :  { %2754 = vtanh.f32 %v2072_v33 }
 0x526   :  { %v2167_v36 = vmul.f32 0.5, %v2135_v41  ;;  %v1932_v51 = vpop.f32.mrf.mxu0 }
 0x527   :  { %v2021_v1 = vpop.f32.mrf.mxu1  ;;  %v1933_v42 = vadd.f32 %v4399_v28, %v1932_v51 }
 0x528   :  { %v2631_v29 = vpack.c.bf16 %v2167_v36, %v2166_v27 }
 0x529   :  { %v2022_v63 = vadd.f32 %v2021_v1, %v1933_v42 }
 0x52a   :  { %2675 = vst [vmem:[#allocation13 + $0x40] sm:$0xff] %v2631_v29  }
 0x52b   :  { %v2073_v8 = vmul.f32 0.5, %v2022_v63  ;;  %v2755_v49 = vpop.eup %2754 }
 0x52c   :  { %v2136_v53 = vadd.f32 1.0, %v2755_v49 }
 0x52d   :  { %2756 = vtanh.f32 %v2073_v8 }
 0x52e   :  { %v1935_v43 = vpop.f32.mrf.mxu0  ;;  %v2168_v44 = vmul.f32 0.5, %v2136_v53 }
 0x52f   :  { %v2024_v17 = vpop.f32.mrf.mxu1  ;;  %v1936_v30 = vadd.f32 %v4399_v28, %v1935_v43 }
 0x531   :  { %v2025_v4 = vadd.f32 %v2024_v17, %v1936_v30 }
 0x533   :  { %v2757_v37 = vpop.eup %2756  ;;  %v2074_v13 = vmul.f32 0.5, %v2025_v4 }
 0x534   :  { %v2137_v60 = vadd.f32 1.0, %v2757_v37 }
 0x535   :  { %2758 = vtanh.f32 %v2074_v13 }
 0x536   :  { %v2169_v14 = vmul.f32 0.5, %v2137_v60  ;;  %v1937_v10 = vpop.f32.mrf.mxu0 }
 0x537   :  { %v2026_v50 = vpop.f32.mrf.mxu1  ;;  %v1938_v19 = vadd.f32 %v4399_v28, %v1937_v10 }
 0x538   :  { %v2636_v5 = vpack.c.bf16 %v2169_v14, %v2168_v44 }
 0x539   :  { %v2027_v39 = vadd.f32 %v2026_v50, %v1938_v19 }
 0x53a   :  { %2676 = vst [vmem:[#allocation13 + $0x48] sm:$0xff] %v2636_v5  }
 0x53b   :  { %v2075_v32 = vmul.f32 0.5, %v2027_v39  ;;  %v2759_v9 = vpop.eup %2758 }
 0x53c   :  { %v2138_v61 = vadd.f32 1.0, %v2759_v9 }
 0x53d   :  { %2760 = vtanh.f32 %v2075_v32 }
 0x53e   :  { %v1940_v24 = vpop.f32.mrf.mxu0  ;;  %v2170_v45 = vmul.f32 0.5, %v2138_v61 }
 0x53f   :  { %v2029_v7 = vpop.f32.mrf.mxu1  ;;  %v1941_v12 = vadd.f32 %v4399_v28, %v1940_v24 }
 0x541   :  { %v2030_v38 = vadd.f32 %v2029_v7, %v1941_v12 }
 0x543   :  { %v2761_v0 = vpop.eup %2760  ;;  %v2076_v46 = vmul.f32 0.5, %v2030_v38 }
 0x544   :  { %v2139_v3 = vadd.f32 1.0, %v2761_v0 }
 0x545   :  { %2762 = vtanh.f32 %v2076_v46 }
 0x546   :  { %v2171_v52 = vmul.f32 0.5, %v2139_v3  ;;  %v1942_v54 = vpop.f32.mrf.mxu0 }
 0x547   :  { %v2031_v31 = vpop.f32.mrf.mxu1  ;;  %v1943_v34 = vadd.f32 %v4399_v28, %v1942_v54 }
 0x548   :  { %v2641_v15 = vpack.c.bf16 %v2171_v52, %v2170_v45 }
 0x549   :  { %v2032_v56 = vadd.f32 %v2031_v31, %v1943_v34 }
 0x54a   :  { %2677 = vst [vmem:[#allocation13 + $0x50] sm:$0xff] %v2641_v15  }
 0x54b   :  { %v2077_v62 = vmul.f32 0.5, %v2032_v56  ;;  %v2763_v18 = vpop.eup %2762 }
 0x54c   :  { %v2140_v58 = vadd.f32 1.0, %v2763_v18 }
 0x54d   :  { %2764 = vtanh.f32 %v2077_v62 }
 0x54e   :  { %v1945_v48 = vpop.f32.mrf.mxu0  ;;  %v2172_v26 = vmul.f32 0.5, %v2140_v58 }
 0x54f   :  { %v2034_v57 = vpop.f32.mrf.mxu1  ;;  %v1946_v25 = vadd.f32 %v4399_v28, %v1945_v48 }
 0x551   :  { %v2035_v11 = vadd.f32 %v2034_v57, %v1946_v25 }
 0x553   :  { %v2765_v22 = vpop.eup %2764  ;;  %v2078_v40 = vmul.f32 0.5, %v2035_v11 }
 0x554   :  { %v2141_v16 = vadd.f32 1.0, %v2765_v22 }
 0x555   :  { %2766 = vtanh.f32 %v2078_v40 }
 0x556   :  { %v2173_v23 = vmul.f32 0.5, %v2141_v16  ;;  %v1947_v2 = vpop.f32.mrf.mxu0 }
 0x557   :  { %v2036_v59 = vpop.f32.mrf.mxu1  ;;  %v1948_v47 = vadd.f32 %v4399_v28, %v1947_v2 }
 0x558   :  { %v2646_v20 = vpack.c.bf16 %v2173_v23, %v2172_v26 }
 0x559   :  { %v2037_v6 = vadd.f32 %v2036_v59, %v1948_v47 }
 0x55a   :  { %2678 = vst [vmem:[#allocation13 + $0x58] sm:$0xff] %v2646_v20  }
 0x55b   :  { %v2079_v21 = vmul.f32 0.5, %v2037_v6  ;;  %v2767_v41 = vpop.eup %2766 }
 0x55c   :  { %v2142_v36 = vadd.f32 1.0, %v2767_v41 }
 0x55d   :  { %2768 = vtanh.f32 %v2079_v21 }
 0x55e   :  { %v1950_v55 = vpop.f32.mrf.mxu0  ;;  %v2174_v29 = vmul.f32 0.5, %v2142_v36 }
 0x55f   :  { %v2039_v35 = vpop.f32.mrf.mxu1  ;;  %v1951_v33 = vadd.f32 %v4399_v28, %v1950_v55 }
 0x561   :  { %v2040_v27 = vadd.f32 %v2039_v35, %v1951_v33 }
 0x563   :  { %v2769_v51 = vpop.eup %2768  ;;  %v2080_v42 = vmul.f32 0.5, %v2040_v27 }
 0x564   :  { %v2143_v1 = vadd.f32 1.0, %v2769_v51 }
 0x565   :  { %2770 = vtanh.f32 %v2080_v42 }
 0x566   :  { %v2175_v63 = vmul.f32 0.5, %v2143_v1  ;;  %v1952_v8 = vpop.f32.mrf.mxu0 }
 0x567   :  { %v2041_v43 = vpop.f32.mrf.mxu1  ;;  %v1953_v17 = vadd.f32 %v4399_v28, %v1952_v8 }
 0x568   :  { %v2651_v49 = vpack.c.bf16 %v2175_v63, %v2174_v29 }
 0x569   :  { %v2042_v30 = vadd.f32 %v2041_v43, %v1953_v17 }
 0x56a   :  { %2679 = vst [vmem:[#allocation13 + $0x60] sm:$0xff] %v2651_v49  }
 0x56b   :  { %v2081_v4 = vmul.f32 0.5, %v2042_v30  ;;  %v2771_v60 = vpop.eup %2770 }
 0x56c   :  { %v2144_v14 = vadd.f32 1.0, %v2771_v60 }
 0x56d   :  { %2772 = vtanh.f32 %v2081_v4 }
 0x56e   :  { %v1955_v53 = vpop.f32.mrf.mxu0  ;;  %v2176_v5 = vmul.f32 0.5, %v2144_v14 }
 0x56f   :  { %v2044_v37 = vpop.f32.mrf.mxu1  ;;  %v1956_v13 = vadd.f32 %v4399_v28, %v1955_v53 }
 0x571   :  { %v2045_v44 = vadd.f32 %v2044_v37, %v1956_v13 }
 0x573   :  { %v2773_v10 = vpop.eup %2772  ;;  %v2082_v19 = vmul.f32 0.5, %v2045_v44 }
 0x574   :  { %v2145_v50 = vadd.f32 1.0, %v2773_v10 }
 0x575   :  { %2774 = vtanh.f32 %v2082_v19 }
 0x576   :  { %v2177_v39 = vmul.f32 0.5, %v2145_v50  ;;  %v1957_v32 = vpop.f32.mrf.mxu0 }
 0x577   :  { %v2046_v24 = vpop.f32.mrf.mxu1  ;;  %v1958_v7 = vadd.f32 %v4399_v28, %v1957_v32 }
 0x578   :  { %v2656_v9 = vpack.c.bf16 %v2177_v39, %v2176_v5 }
 0x579   :  { %v2047_v12 = vadd.f32 %v2046_v24, %v1958_v7 }
 0x57a   :  { %2680 = vst [vmem:[#allocation13 + $0x68] sm:$0xff] %v2656_v9  }
 0x57b   :  { %v2083_v38 = vmul.f32 0.5, %v2047_v12  ;;  %v2775_v3 = vpop.eup %2774 }
 0x57c   :  { %v2146_v52 = vadd.f32 1.0, %v2775_v3 }
 0x57d   :  { %2776 = vtanh.f32 %v2083_v38 }
 0x57e   :  { %v1960_v61 = vpop.f32.mrf.mxu0  ;;  %v2178_v15 = vmul.f32 0.5, %v2146_v52 }
 0x57f   :  { %v2049_v0 = vpop.f32.mrf.mxu1  ;;  %v1961_v46 = vadd.f32 %v4399_v28, %v1960_v61 }
 0x581   :  { %v2050_v45 = vadd.f32 %v2049_v0, %v1961_v46 }
 0x583   :  { %v2777_v54 = vpop.eup %2776  ;;  %v2084_v34 = vmul.f32 0.5, %v2050_v45 }
 0x584   :  { %v2147_v31 = vadd.f32 1.0, %v2777_v54 }
 0x585   :  { %2778 = vtanh.f32 %v2084_v34 }
 0x586   :  { %v2179_v56 = vmul.f32 0.5, %v2147_v31  ;;  %v1962_v62 = vpop.f32.mrf.mxu0 }
 0x587   :  { %v1963_v48 = vadd.f32 %v4399_v28, %v1962_v62  ;;  %v2051_v18 = vpop.f32.mrf.mxu1 }
 0x588   :  { %v2661_v57 = vpack.c.bf16 %v2179_v56, %v2178_v15 }
 0x589   :  { %v2052_v25 = vadd.f32 %v2051_v18, %v1963_v48 }
 0x58a   :  { %2681 = vst [vmem:[#allocation13 + $0x70] sm:$0xff] %v2661_v57  }
 0x58b   :  { %v2085_v11 = vmul.f32 0.5, %v2052_v25  ;;  %v2779_v58 = vpop.eup %2778 }
 0x58c   :  { %v2148_v22 = vadd.f32 1.0, %v2779_v58 }
 0x58d   :  { %2780 = vtanh.f32 %v2085_v11 }
 0x58e   :  { %v2180_v26 = vmul.f32 0.5, %v2148_v22 }
 0x593   :  { %v2781_v16 = vpop.eup %2780 }
 0x594   :  { %v2149_v40 = vadd.f32 1.0, %v2781_v16 }
 0x596   :  { %v2181_v23 = vmul.f32 0.5, %v2149_v40 }
 0x598   :  { %v2666_v28 = vpack.c.bf16 %v2181_v23, %v2180_v26 }
 0x59a   :  { %2682 = vst [vmem:[#allocation13 + $0x78] sm:$0xff] %v2666_v28  }
 0x59b   :  { %2258 = dma.vmem_to_hbm [thread:$0]  %s2251_s26, 2048, %s2253_s7, [#allocation4], %s2961_s29, %s2961_s29, %s2962_s30  }
 0x59c   :  { %2958 = dma.done.wait [#allocation4], 2048  }
 0x59d   :  { %2959 = vsyncadd [#allocation4], 4294965248 }
 0x59e   :  { %2263 = vsyncpa [#allocation3], 1 }
 0x59f   :  { %2264 = vsyncpa [#allocation6], 1 }
 0x5a0   :  { %2265 = vsyncpa [#allocation9], 1 }
 0x5a1   :  { %2266 = vsyncpa [#allocation12], 1 }
 0x5a2   :  { %2267 = vsyncpa [#allocation4], 1 }

</bundles_post_ra>
